<compile_context>
chip_gen: v7x
topology: tpu7x:2x2x1
jax: 0.10.0
libtpu: 0.0.40
codegen_flags: <defaults>
</compile_context>

<pallas_src>
import functools
import math

import jax
import jax.numpy as jnp
from jax.experimental import pallas as pl
from jax.experimental.pallas import tpu as pltpu


# -----------------------------------------------------------------------------
# Small in-kernel helper: tile x along lanes with O(log reps) concatenations.
# -----------------------------------------------------------------------------
def _lane_tile(x, reps):
    out = None
    piece = x
    r = reps
    while r > 0:
        if r & 1:
            out = piece if out is None else jnp.concatenate([out, piece], axis=-1)
        r >>= 1
        if r:
            piece = jnp.concatenate([piece, piece], axis=-1)
    return out


# -----------------------------------------------------------------------------
# Fused kernel: DMA embedding gather -> KAN layers -> sigmoid.
# -----------------------------------------------------------------------------
def _kan_model_kernel(u_idx_ref, i_idx_ref, emb_user_hbm, emb_item_hbm, *rest,
                      k, n_layers):
    layer_refs = rest[:4 * n_layers]
    o_ref = rest[4 * n_layers]
    ue_buf, ie_buf, sem = rest[4 * n_layers + 1:]

    B, _ = ue_buf.shape

    # ---- embedding gather: per-row DMA from HBM tables into VMEM staging ----
    def row_copy(tbl, idx, dst, s):
        return pltpu.make_async_copy(tbl.at[pl.ds(idx, 1)], dst, s)

    for b in range(B):
        row_copy(emb_user_hbm, u_idx_ref[b], ue_buf.at[pl.ds(b, 1)],
                 sem.at[0, b]).start()
        row_copy(emb_item_hbm, i_idx_ref[b], ie_buf.at[pl.ds(b, 1)],
                 sem.at[1, b]).start()
    for b in range(B):
        row_copy(emb_user_hbm, 0, ue_buf.at[pl.ds(b, 1)], sem.at[0, b]).wait()
        row_copy(emb_item_hbm, 0, ie_buf.at[pl.ds(b, 1)], sem.at[1, b]).wait()

    x = jnp.concatenate([ue_buf[...], ie_buf[...]], axis=-1)   # (B, 2L) f32

    # ---- KAN layers ----------------------------------------------------------
    for l in range(n_layers):
        gp_ref, wsp_ref, wbase_ref, b_ref = layer_refs[4 * l: 4 * l + 4]
        gp = gp_ref[...]                          # (2 + 3k, Wl) f32 grid pack
        I = x.shape[1]
        Wl = gp.shape[1]                          # n0_pad * I, multiple of 128

        # lane j*I + i holds x_i, for every basis block j (all blocks identical)
        x_tiled = _lane_tile(x, Wl // I)          # (B, Wl)

        # Order-0 B-spline basis (indicator), lane-packed, constant width.
        t_lo = gp[0:1, :]                         # t_j
        basis = jnp.where((x_tiled >= t_lo) & (x_tiled < gp[1:2, :]),
                          jnp.float32(1.0), jnp.float32(0.0))

        # Cox-de Boor recursion (k static -> unrolled), constant shape.
        # Denominators are precomputed reciprocals (no divides).  Junk blocks
        # j >= n0 - p never feed valid ones and hit zero rows of w_sp.
        for p in range(1, k + 1):
            r = 2 + 3 * (p - 1)
            t_hi = gp[r:r + 1, :]                 # t_{j+p+1}
            inv_lo = gp[r + 1:r + 2, :]           # 1/(t_{j+p}   - t_j)
            inv_hi = gp[r + 2:r + 3, :]           # 1/(t_{j+p+1} - t_{j+1})
            left = (x_tiled - t_lo) * inv_lo
            right = (t_hi - x_tiled) * inv_hi
            basis = left * basis + right * pltpu.roll(basis, shift=Wl - I, axis=1)

        # Spline + base(silu) contributions: two bf16 MXU dots, f32 accum.
        silu_x = x * jax.nn.sigmoid(x)
        y = (jnp.dot(basis.astype(jnp.bfloat16), wsp_ref[...],
                     preferred_element_type=jnp.float32)
             + jnp.dot(silu_x.astype(jnp.bfloat16), wbase_ref[...],
                       preferred_element_type=jnp.float32)
             + b_ref[...])

        x = jax.nn.sigmoid(y) if l == n_layers - 1 else y

    o_ref[...] = x   # lane-dense (B, O_pad) store; wrapper slices real width.


# -----------------------------------------------------------------------------
# Host-side parameter packing (glue).
# -----------------------------------------------------------------------------
def _pad_blocks(n0, I):
    """Smallest #blocks >= n0 whose lane width (#blocks * I) is a 128-multiple."""
    step = 128 // math.gcd(128, I)
    return ((n0 + step - 1) // step) * step


def _pack_layer_grid(grid_ext, k, n0_pad):
    """grid_ext: (I, M) extended knots -> (2+3k, n0_pad*I) constant-width pack."""
    grid_ext = jnp.asarray(grid_ext, jnp.float32)
    I, M = grid_ext.shape
    n0 = M - 1

    def lanepack(a, pad_value):   # (I, n) [i, j] -> (1, n0_pad*I), lane = j*I + i
        n = a.shape[1]
        a = jnp.pad(a, ((0, 0), (0, n0_pad - n)), constant_values=pad_value)
        return a.T.reshape(1, -1)

    rows = [lanepack(grid_ext[:, :M - 1], 0.0),      # t_j
            lanepack(grid_ext[:, 1:M], 0.0)]         # t_{j+1}
    for p in range(1, k + 1):
        n_p = n0 - p
        t_hi = grid_ext[:, p + 1: p + 1 + n_p]                          # t_{j+p+1}
        den_lo = grid_ext[:, p: p + n_p] - grid_ext[:, 0: n_p]          # t_{j+p}-t_j
        den_hi = grid_ext[:, p + 1: p + 1 + n_p] - grid_ext[:, 1: 1 + n_p]
        rows.append(lanepack(t_hi, 0.0))
        rows.append(lanepack(1.0 / den_lo, 1.0))
        rows.append(lanepack(1.0 / den_hi, 1.0))
    return jnp.concatenate(rows, axis=0)


def _pack_layer_weights(coef, scale_sp, scale_base, mask, bias, n0_pad, out_pad=None):
    """Fold mask/scales/coef into bf16 (n0_pad*I, O[_pad]) + (I, O[_pad]) weights."""
    I, O, J = coef.shape
    w_sp = (mask * scale_sp)[:, :, None] * coef                 # (I, O, J)
    w_sp = jnp.transpose(w_sp, (2, 0, 1)).reshape(J * I, O)     # row index j*I + i
    # Zero rows for padded / invalid basis blocks j in [J, n0_pad): the kernel
    # contracts the full constant-width basis without slicing it.
    w_sp = jnp.pad(w_sp, ((0, (n0_pad - J) * I), (0, 0)))
    w_base = mask * scale_base                                  # (I, O)
    b = jnp.asarray(bias, jnp.float32)
    if out_pad is not None and out_pad > O:
        w_sp = jnp.pad(w_sp, ((0, 0), (0, out_pad - O)))
        w_base = jnp.pad(w_base, ((0, 0), (0, out_pad - O)))
        b = jnp.pad(b, ((0, 0), (0, out_pad - O)))
    return w_sp.astype(jnp.bfloat16), w_base.astype(jnp.bfloat16), b


def init_params(config, key):
    num_users = config['num_users']
    num_items = config['num_items']
    latent_dim = config['latent_dim']
    layers = config['layers']
    G = config['grid']
    k = config['k']
    assert layers[0] == 2 * latent_dim

    n_layers = len(layers) - 1
    keys = jax.random.split(key, 2 + 2 * n_layers)

    emb_user = 0.1 * jax.random.normal(keys[0], (num_users, latent_dim), jnp.float32)
    emb_item = 0.1 * jax.random.normal(keys[1], (num_items, latent_dim), jnp.float32)

    params = {
        'embedding_user': emb_user,
        'embedding_item': emb_item,
        'kan_layers': [],
    }

    # Uniform extended grid on grid_range=[-1, 1] (pykan default), same per input.
    M = G + 2 * k + 1
    h = 2.0 / G
    grid_1d = jnp.arange(-k, G + k + 1, dtype=jnp.float32) * h - 1.0   # (M,)

    ki = 2
    for l in range(n_layers):
        I, O = layers[l], layers[l + 1]
        J = G + k
        n0 = M - 1
        n0_pad = _pad_blocks(n0, I)

        coef = 0.1 * jax.random.normal(keys[ki], (I, O, J), jnp.float32); ki += 1
        scale_base = jax.random.normal(keys[ki], (I, O), jnp.float32) / jnp.sqrt(I); ki += 1
        scale_sp = jnp.ones((I, O), jnp.float32)
        mask = jnp.ones((I, O), jnp.float32)
        bias = jnp.zeros((1, O), jnp.float32)

        grid_ext = jnp.broadcast_to(grid_1d[None, :], (I, M))

        is_last = (l == n_layers - 1)
        out_pad = ((O + 127) // 128) * 128 if is_last else None
        w_sp, w_base, bias_p = _pack_layer_weights(coef, scale_sp, scale_base,
                                                   mask, bias, n0_pad, out_pad)
        params['kan_layers'].append(dict(
            grid_pack=_pack_layer_grid(grid_ext, k, n0_pad),
            w_sp=w_sp,
            w_base=w_base,
            bias=bias_p,
        ))
    return params


# -----------------------------------------------------------------------------
# Forward wrapper (single gridless pallas_call).
# -----------------------------------------------------------------------------
def kan_model_forward(params, config, user_indices, item_indices):
    B = user_indices.shape[0]
    out_dim = config['layers'][-1]
    n_layers = len(params['kan_layers'])
    out_pad = params['kan_layers'][-1]['w_base'].shape[1]
    L = config['latent_dim']

    args = [user_indices.astype(jnp.int32),
            item_indices.astype(jnp.int32),
            params['embedding_user'],
            params['embedding_item']]
    smem = pl.BlockSpec(memory_space=pltpu.MemorySpace.SMEM)
    vmem = pl.BlockSpec(memory_space=pltpu.MemorySpace.VMEM)
    hbm = pl.BlockSpec(memory_space=pl.ANY)
    in_specs = [smem, smem, hbm, hbm]
    for layer in params['kan_layers']:
        args += [layer['grid_pack'], layer['w_sp'], layer['w_base'], layer['bias']]
        in_specs += [vmem, vmem, vmem, vmem]

    # Advisory cost estimate for XLA scheduling around the custom call.
    flops = 0
    transcendentals = 0
    bytes_accessed = 2 * B * L * 4 + B * out_pad * 4 + 2 * B * 4
    for layer in params['kan_layers']:
        ksp, osp = layer['w_sp'].shape
        kb, ob = layer['w_base'].shape
        flops += 2 * B * (ksp * osp + kb * ob) + 8 * B * ksp
        transcendentals += B * kb
        bytes_accessed += (layer['grid_pack'].size * 4 + layer['w_sp'].size * 2
                           + layer['w_base'].size * 2 + layer['bias'].size * 4)
    transcendentals += B * out_pad

    kernel = functools.partial(_kan_model_kernel, k=config['k'], n_layers=n_layers)
    out = pl.pallas_call(
        kernel,
        out_shape=jax.ShapeDtypeStruct((B, out_pad), jnp.float32),
        in_specs=in_specs,
        out_specs=vmem,
        scratch_shapes=[pltpu.VMEM((B, L), jnp.float32),        # user rows
                        pltpu.VMEM((B, L), jnp.float32),        # item rows
                        pltpu.SemaphoreType.DMA((2, B))],
        cost_estimate=pl.CostEstimate(flops=int(flops),
                                      transcendentals=int(transcendentals),
                                      bytes_accessed=int(bytes_accessed)),
        compiler_params=pltpu.CompilerParams(vmem_limit_bytes=32 * 1024 * 1024),
    )(*args)
    # Slice the lane-dense padded slab back to the model's output width.
    return out[:, :out_dim]


if __name__ == "__main__":
    config = dict(
        num_users=10,
        num_items=12,
        latent_dim=8,
        layers=[16, 32, 1],     # KAN width; input = 2 * latent_dim
        grid=5,
        k=3,
        seed=0,
        use_cuda=False,
    )

    key = jax.random.PRNGKey(0)
    pkey, ukey, ikey = jax.random.split(key, 3)
    params = init_params(config, pkey)

    B = 8
    user_indices = jax.random.randint(ukey, (B,), 0, config['num_users'], dtype=jnp.int32)
    item_indices = jax.random.randint(ikey, (B,), 0, config['num_items'], dtype=jnp.int32)

    fwd = jax.jit(lambda p, u, i: kan_model_forward(p, config, u, i))
    rating = jax.block_until_ready(fwd(params, user_indices, item_indices))

    assert rating.shape == (B, config['layers'][-1])
    assert bool(jnp.all((rating > 0.0) & (rating < 1.0)))
    print("KERNEL_OK")
</pallas_src>

<mosaic_0001>
module attributes {stable_mosaic.version = 11 : i64} {
  func.func @_kan_model_kernel(%arg0: memref<8xi32, #tpu.memory_space<smem>>, %arg1: memref<8xi32, #tpu.memory_space<smem>>, %arg2: memref<10x8xf32, #tpu.memory_space<any>>, %arg3: memref<12x8xf32, #tpu.memory_space<any>>, %arg4: memref<11x256xf32, #tpu.memory_space<vmem>>, %arg5: memref<256x32xbf16, #tpu.memory_space<vmem>>, %arg6: memref<16x32xbf16, #tpu.memory_space<vmem>>, %arg7: memref<1x32xf32, #tpu.memory_space<vmem>>, %arg8: memref<11x384xf32, #tpu.memory_space<vmem>>, %arg9: memref<384x128xbf16, #tpu.memory_space<vmem>>, %arg10: memref<32x128xbf16, #tpu.memory_space<vmem>>, %arg11: memref<1x128xf32, #tpu.memory_space<vmem>>, %arg12: memref<8x128xf32, #tpu.memory_space<vmem>>, %arg13: memref<8x8xf32, #tpu.memory_space<vmem>>, %arg14: memref<8x8xf32, #tpu.memory_space<vmem>>, %arg15: memref<2x8x!tpu.dma_semaphore, #tpu.memory_space<semaphore_mem>>) attributes {dimension_semantics = [], scalar_prefetch = 0 : i64, scratch_operands = 3 : i64, tpu.core_type = #tpu.core_type<tc>} {
    %c0 = arith.constant 0 : index
    %0 = memref.load %arg0[%c0] : memref<8xi32, #tpu.memory_space<smem>>
    %c0_i32 = arith.constant 0 : i32
    %c0_i32_0 = arith.constant 0 : i32
    %c0_i32_1 = arith.constant 0 : i32
    %1 = tpu.memref_slice %arg2[%0, %c0_i32_1] : memref<10x8xf32, #tpu.memory_space<any>> -> memref<1x8xf32, #tpu.memory_space<any>>
    %c0_i32_2 = arith.constant 0 : i32
    %c0_i32_3 = arith.constant 0 : i32
    %2 = tpu.memref_slice %arg13[%c0_i32_2, %c0_i32_3] : memref<8x8xf32, #tpu.memory_space<vmem>> -> memref<1x8xf32, #tpu.memory_space<vmem>>
    %3 = tpu.memref_slice %arg15[%c0_i32, %c0_i32_0] : memref<2x8x!tpu.dma_semaphore, #tpu.memory_space<semaphore_mem>> -> memref<1x1x!tpu.dma_semaphore, #tpu.memory_space<semaphore_mem>>
    %4 = tpu.memref_squeeze %3 : memref<1x1x!tpu.dma_semaphore, #tpu.memory_space<semaphore_mem>> -> memref<!tpu.dma_semaphore, #tpu.memory_space<semaphore_mem>>
    tpu.enqueue_dma source(%1 : memref<1x8xf32, #tpu.memory_space<any>>) target(%2 : memref<1x8xf32, #tpu.memory_space<vmem>>) target_semaphore(%4 : memref<!tpu.dma_semaphore, #tpu.memory_space<semaphore_mem>>)
    %c0_4 = arith.constant 0 : index
    %5 = memref.load %arg1[%c0_4] : memref<8xi32, #tpu.memory_space<smem>>
    %c1_i32 = arith.constant 1 : i32
    %c0_i32_5 = arith.constant 0 : i32
    %c0_i32_6 = arith.constant 0 : i32
    %6 = tpu.memref_slice %arg3[%5, %c0_i32_6] : memref<12x8xf32, #tpu.memory_space<any>> -> memref<1x8xf32, #tpu.memory_space<any>>
    %c0_i32_7 = arith.constant 0 : i32
    %c0_i32_8 = arith.constant 0 : i32
    %7 = tpu.memref_slice %arg14[%c0_i32_7, %c0_i32_8] : memref<8x8xf32, #tpu.memory_space<vmem>> -> memref<1x8xf32, #tpu.memory_space<vmem>>
    %8 = tpu.memref_slice %arg15[%c1_i32, %c0_i32_5] : memref<2x8x!tpu.dma_semaphore, #tpu.memory_space<semaphore_mem>> -> memref<1x1x!tpu.dma_semaphore, #tpu.memory_space<semaphore_mem>>
    %9 = tpu.memref_squeeze %8 : memref<1x1x!tpu.dma_semaphore, #tpu.memory_space<semaphore_mem>> -> memref<!tpu.dma_semaphore, #tpu.memory_space<semaphore_mem>>
    tpu.enqueue_dma source(%6 : memref<1x8xf32, #tpu.memory_space<any>>) target(%7 : memref<1x8xf32, #tpu.memory_space<vmem>>) target_semaphore(%9 : memref<!tpu.dma_semaphore, #tpu.memory_space<semaphore_mem>>)
    %c1 = arith.constant 1 : index
    %10 = memref.load %arg0[%c1] : memref<8xi32, #tpu.memory_space<smem>>
    %c0_i32_9 = arith.constant 0 : i32
    %c1_i32_10 = arith.constant 1 : i32
    %c0_i32_11 = arith.constant 0 : i32
    %11 = tpu.memref_slice %arg2[%10, %c0_i32_11] : memref<10x8xf32, #tpu.memory_space<any>> -> memref<1x8xf32, #tpu.memory_space<any>>
    %c1_i32_12 = arith.constant 1 : i32
    %c0_i32_13 = arith.constant 0 : i32
    %12 = tpu.memref_slice %arg13[%c1_i32_12, %c0_i32_13] : memref<8x8xf32, #tpu.memory_space<vmem>> -> memref<1x8xf32, #tpu.memory_space<vmem>>
    %13 = tpu.memref_slice %arg15[%c0_i32_9, %c1_i32_10] : memref<2x8x!tpu.dma_semaphore, #tpu.memory_space<semaphore_mem>> -> memref<1x1x!tpu.dma_semaphore, #tpu.memory_space<semaphore_mem>>
    %14 = tpu.memref_squeeze %13 : memref<1x1x!tpu.dma_semaphore, #tpu.memory_space<semaphore_mem>> -> memref<!tpu.dma_semaphore, #tpu.memory_space<semaphore_mem>>
    tpu.enqueue_dma source(%11 : memref<1x8xf32, #tpu.memory_space<any>>) target(%12 : memref<1x8xf32, #tpu.memory_space<vmem>>) target_semaphore(%14 : memref<!tpu.dma_semaphore, #tpu.memory_space<semaphore_mem>>)
    %c1_14 = arith.constant 1 : index
    %15 = memref.load %arg1[%c1_14] : memref<8xi32, #tpu.memory_space<smem>>
    %c1_i32_15 = arith.constant 1 : i32
    %c1_i32_16 = arith.constant 1 : i32
    %c0_i32_17 = arith.constant 0 : i32
    %16 = tpu.memref_slice %arg3[%15, %c0_i32_17] : memref<12x8xf32, #tpu.memory_space<any>> -> memref<1x8xf32, #tpu.memory_space<any>>
    %c1_i32_18 = arith.constant 1 : i32
    %c0_i32_19 = arith.constant 0 : i32
    %17 = tpu.memref_slice %arg14[%c1_i32_18, %c0_i32_19] : memref<8x8xf32, #tpu.memory_space<vmem>> -> memref<1x8xf32, #tpu.memory_space<vmem>>
    %18 = tpu.memref_slice %arg15[%c1_i32_15, %c1_i32_16] : memref<2x8x!tpu.dma_semaphore, #tpu.memory_space<semaphore_mem>> -> memref<1x1x!tpu.dma_semaphore, #tpu.memory_space<semaphore_mem>>
    %19 = tpu.memref_squeeze %18 : memref<1x1x!tpu.dma_semaphore, #tpu.memory_space<semaphore_mem>> -> memref<!tpu.dma_semaphore, #tpu.memory_space<semaphore_mem>>
    tpu.enqueue_dma source(%16 : memref<1x8xf32, #tpu.memory_space<any>>) target(%17 : memref<1x8xf32, #tpu.memory_space<vmem>>) target_semaphore(%19 : memref<!tpu.dma_semaphore, #tpu.memory_space<semaphore_mem>>)
    %c2 = arith.constant 2 : index
    %20 = memref.load %arg0[%c2] : memref<8xi32, #tpu.memory_space<smem>>
    %c0_i32_20 = arith.constant 0 : i32
    %c2_i32 = arith.constant 2 : i32
    %c0_i32_21 = arith.constant 0 : i32
    %21 = tpu.memref_slice %arg2[%20, %c0_i32_21] : memref<10x8xf32, #tpu.memory_space<any>> -> memref<1x8xf32, #tpu.memory_space<any>>
    %c2_i32_22 = arith.constant 2 : i32
    %c0_i32_23 = arith.constant 0 : i32
    %22 = tpu.memref_slice %arg13[%c2_i32_22, %c0_i32_23] : memref<8x8xf32, #tpu.memory_space<vmem>> -> memref<1x8xf32, #tpu.memory_space<vmem>>
    %23 = tpu.memref_slice %arg15[%c0_i32_20, %c2_i32] : memref<2x8x!tpu.dma_semaphore, #tpu.memory_space<semaphore_mem>> -> memref<1x1x!tpu.dma_semaphore, #tpu.memory_space<semaphore_mem>>
    %24 = tpu.memref_squeeze %23 : memref<1x1x!tpu.dma_semaphore, #tpu.memory_space<semaphore_mem>> -> memref<!tpu.dma_semaphore, #tpu.memory_space<semaphore_mem>>
    tpu.enqueue_dma source(%21 : memref<1x8xf32, #tpu.memory_space<any>>) target(%22 : memref<1x8xf32, #tpu.memory_space<vmem>>) target_semaphore(%24 : memref<!tpu.dma_semaphore, #tpu.memory_space<semaphore_mem>>)
    %c2_24 = arith.constant 2 : index
    %25 = memref.load %arg1[%c2_24] : memref<8xi32, #tpu.memory_space<smem>>
    %c1_i32_25 = arith.constant 1 : i32
    %c2_i32_26 = arith.constant 2 : i32
    %c0_i32_27 = arith.constant 0 : i32
    %26 = tpu.memref_slice %arg3[%25, %c0_i32_27] : memref<12x8xf32, #tpu.memory_space<any>> -> memref<1x8xf32, #tpu.memory_space<any>>
    %c2_i32_28 = arith.constant 2 : i32
    %c0_i32_29 = arith.constant 0 : i32
    %27 = tpu.memref_slice %arg14[%c2_i32_28, %c0_i32_29] : memref<8x8xf32, #tpu.memory_space<vmem>> -> memref<1x8xf32, #tpu.memory_space<vmem>>
    %28 = tpu.memref_slice %arg15[%c1_i32_25, %c2_i32_26] : memref<2x8x!tpu.dma_semaphore, #tpu.memory_space<semaphore_mem>> -> memref<1x1x!tpu.dma_semaphore, #tpu.memory_space<semaphore_mem>>
    %29 = tpu.memref_squeeze %28 : memref<1x1x!tpu.dma_semaphore, #tpu.memory_space<semaphore_mem>> -> memref<!tpu.dma_semaphore, #tpu.memory_space<semaphore_mem>>
    tpu.enqueue_dma source(%26 : memref<1x8xf32, #tpu.memory_space<any>>) target(%27 : memref<1x8xf32, #tpu.memory_space<vmem>>) target_semaphore(%29 : memref<!tpu.dma_semaphore, #tpu.memory_space<semaphore_mem>>)
    %c3 = arith.constant 3 : index
    %30 = memref.load %arg0[%c3] : memref<8xi32, #tpu.memory_space<smem>>
    %c0_i32_30 = arith.constant 0 : i32
    %c3_i32 = arith.constant 3 : i32
    %c0_i32_31 = arith.constant 0 : i32
    %31 = tpu.memref_slice %arg2[%30, %c0_i32_31] : memref<10x8xf32, #tpu.memory_space<any>> -> memref<1x8xf32, #tpu.memory_space<any>>
    %c3_i32_32 = arith.constant 3 : i32
    %c0_i32_33 = arith.constant 0 : i32
    %32 = tpu.memref_slice %arg13[%c3_i32_32, %c0_i32_33] : memref<8x8xf32, #tpu.memory_space<vmem>> -> memref<1x8xf32, #tpu.memory_space<vmem>>
    %33 = tpu.memref_slice %arg15[%c0_i32_30, %c3_i32] : memref<2x8x!tpu.dma_semaphore, #tpu.memory_space<semaphore_mem>> -> memref<1x1x!tpu.dma_semaphore, #tpu.memory_space<semaphore_mem>>
    %34 = tpu.memref_squeeze %33 : memref<1x1x!tpu.dma_semaphore, #tpu.memory_space<semaphore_mem>> -> memref<!tpu.dma_semaphore, #tpu.memory_space<semaphore_mem>>
    tpu.enqueue_dma source(%31 : memref<1x8xf32, #tpu.memory_space<any>>) target(%32 : memref<1x8xf32, #tpu.memory_space<vmem>>) target_semaphore(%34 : memref<!tpu.dma_semaphore, #tpu.memory_space<semaphore_mem>>)
    %c3_34 = arith.constant 3 : index
    %35 = memref.load %arg1[%c3_34] : memref<8xi32, #tpu.memory_space<smem>>
    %c1_i32_35 = arith.constant 1 : i32
    %c3_i32_36 = arith.constant 3 : i32
    %c0_i32_37 = arith.constant 0 : i32
    %36 = tpu.memref_slice %arg3[%35, %c0_i32_37] : memref<12x8xf32, #tpu.memory_space<any>> -> memref<1x8xf32, #tpu.memory_space<any>>
    %c3_i32_38 = arith.constant 3 : i32
    %c0_i32_39 = arith.constant 0 : i32
    %37 = tpu.memref_slice %arg14[%c3_i32_38, %c0_i32_39] : memref<8x8xf32, #tpu.memory_space<vmem>> -> memref<1x8xf32, #tpu.memory_space<vmem>>
    %38 = tpu.memref_slice %arg15[%c1_i32_35, %c3_i32_36] : memref<2x8x!tpu.dma_semaphore, #tpu.memory_space<semaphore_mem>> -> memref<1x1x!tpu.dma_semaphore, #tpu.memory_space<semaphore_mem>>
    %39 = tpu.memref_squeeze %38 : memref<1x1x!tpu.dma_semaphore, #tpu.memory_space<semaphore_mem>> -> memref<!tpu.dma_semaphore, #tpu.memory_space<semaphore_mem>>
    tpu.enqueue_dma source(%36 : memref<1x8xf32, #tpu.memory_space<any>>) target(%37 : memref<1x8xf32, #tpu.memory_space<vmem>>) target_semaphore(%39 : memref<!tpu.dma_semaphore, #tpu.memory_space<semaphore_mem>>)
    %c4 = arith.constant 4 : index
    %40 = memref.load %arg0[%c4] : memref<8xi32, #tpu.memory_space<smem>>
    %c0_i32_40 = arith.constant 0 : i32
    %c4_i32 = arith.constant 4 : i32
    %c0_i32_41 = arith.constant 0 : i32
    %41 = tpu.memref_slice %arg2[%40, %c0_i32_41] : memref<10x8xf32, #tpu.memory_space<any>> -> memref<1x8xf32, #tpu.memory_space<any>>
    %c4_i32_42 = arith.constant 4 : i32
    %c0_i32_43 = arith.constant 0 : i32
    %42 = tpu.memref_slice %arg13[%c4_i32_42, %c0_i32_43] : memref<8x8xf32, #tpu.memory_space<vmem>> -> memref<1x8xf32, #tpu.memory_space<vmem>>
    %43 = tpu.memref_slice %arg15[%c0_i32_40, %c4_i32] : memref<2x8x!tpu.dma_semaphore, #tpu.memory_space<semaphore_mem>> -> memref<1x1x!tpu.dma_semaphore, #tpu.memory_space<semaphore_mem>>
    %44 = tpu.memref_squeeze %43 : memref<1x1x!tpu.dma_semaphore, #tpu.memory_space<semaphore_mem>> -> memref<!tpu.dma_semaphore, #tpu.memory_space<semaphore_mem>>
    tpu.enqueue_dma source(%41 : memref<1x8xf32, #tpu.memory_space<any>>) target(%42 : memref<1x8xf32, #tpu.memory_space<vmem>>) target_semaphore(%44 : memref<!tpu.dma_semaphore, #tpu.memory_space<semaphore_mem>>)
    %c4_44 = arith.constant 4 : index
    %45 = memref.load %arg1[%c4_44] : memref<8xi32, #tpu.memory_space<smem>>
    %c1_i32_45 = arith.constant 1 : i32
    %c4_i32_46 = arith.constant 4 : i32
    %c0_i32_47 = arith.constant 0 : i32
    %46 = tpu.memref_slice %arg3[%45, %c0_i32_47] : memref<12x8xf32, #tpu.memory_space<any>> -> memref<1x8xf32, #tpu.memory_space<any>>
    %c4_i32_48 = arith.constant 4 : i32
    %c0_i32_49 = arith.constant 0 : i32
    %47 = tpu.memref_slice %arg14[%c4_i32_48, %c0_i32_49] : memref<8x8xf32, #tpu.memory_space<vmem>> -> memref<1x8xf32, #tpu.memory_space<vmem>>
    %48 = tpu.memref_slice %arg15[%c1_i32_45, %c4_i32_46] : memref<2x8x!tpu.dma_semaphore, #tpu.memory_space<semaphore_mem>> -> memref<1x1x!tpu.dma_semaphore, #tpu.memory_space<semaphore_mem>>
    %49 = tpu.memref_squeeze %48 : memref<1x1x!tpu.dma_semaphore, #tpu.memory_space<semaphore_mem>> -> memref<!tpu.dma_semaphore, #tpu.memory_space<semaphore_mem>>
    tpu.enqueue_dma source(%46 : memref<1x8xf32, #tpu.memory_space<any>>) target(%47 : memref<1x8xf32, #tpu.memory_space<vmem>>) target_semaphore(%49 : memref<!tpu.dma_semaphore, #tpu.memory_space<semaphore_mem>>)
    %c5 = arith.constant 5 : index
    %50 = memref.load %arg0[%c5] : memref<8xi32, #tpu.memory_space<smem>>
    %c0_i32_50 = arith.constant 0 : i32
    %c5_i32 = arith.constant 5 : i32
    %c0_i32_51 = arith.constant 0 : i32
    %51 = tpu.memref_slice %arg2[%50, %c0_i32_51] : memref<10x8xf32, #tpu.memory_space<any>> -> memref<1x8xf32, #tpu.memory_space<any>>
    %c5_i32_52 = arith.constant 5 : i32
    %c0_i32_53 = arith.constant 0 : i32
    %52 = tpu.memref_slice %arg13[%c5_i32_52, %c0_i32_53] : memref<8x8xf32, #tpu.memory_space<vmem>> -> memref<1x8xf32, #tpu.memory_space<vmem>>
    %53 = tpu.memref_slice %arg15[%c0_i32_50, %c5_i32] : memref<2x8x!tpu.dma_semaphore, #tpu.memory_space<semaphore_mem>> -> memref<1x1x!tpu.dma_semaphore, #tpu.memory_space<semaphore_mem>>
    %54 = tpu.memref_squeeze %53 : memref<1x1x!tpu.dma_semaphore, #tpu.memory_space<semaphore_mem>> -> memref<!tpu.dma_semaphore, #tpu.memory_space<semaphore_mem>>
    tpu.enqueue_dma source(%51 : memref<1x8xf32, #tpu.memory_space<any>>) target(%52 : memref<1x8xf32, #tpu.memory_space<vmem>>) target_semaphore(%54 : memref<!tpu.dma_semaphore, #tpu.memory_space<semaphore_mem>>)
    %c5_54 = arith.constant 5 : index
    %55 = memref.load %arg1[%c5_54] : memref<8xi32, #tpu.memory_space<smem>>
    %c1_i32_55 = arith.constant 1 : i32
    %c5_i32_56 = arith.constant 5 : i32
    %c0_i32_57 = arith.constant 0 : i32
    %56 = tpu.memref_slice %arg3[%55, %c0_i32_57] : memref<12x8xf32, #tpu.memory_space<any>> -> memref<1x8xf32, #tpu.memory_space<any>>
    %c5_i32_58 = arith.constant 5 : i32
    %c0_i32_59 = arith.constant 0 : i32
    %57 = tpu.memref_slice %arg14[%c5_i32_58, %c0_i32_59] : memref<8x8xf32, #tpu.memory_space<vmem>> -> memref<1x8xf32, #tpu.memory_space<vmem>>
    %58 = tpu.memref_slice %arg15[%c1_i32_55, %c5_i32_56] : memref<2x8x!tpu.dma_semaphore, #tpu.memory_space<semaphore_mem>> -> memref<1x1x!tpu.dma_semaphore, #tpu.memory_space<semaphore_mem>>
    %59 = tpu.memref_squeeze %58 : memref<1x1x!tpu.dma_semaphore, #tpu.memory_space<semaphore_mem>> -> memref<!tpu.dma_semaphore, #tpu.memory_space<semaphore_mem>>
    tpu.enqueue_dma source(%56 : memref<1x8xf32, #tpu.memory_space<any>>) target(%57 : memref<1x8xf32, #tpu.memory_space<vmem>>) target_semaphore(%59 : memref<!tpu.dma_semaphore, #tpu.memory_space<semaphore_mem>>)
    %c6 = arith.constant 6 : index
    %60 = memref.load %arg0[%c6] : memref<8xi32, #tpu.memory_space<smem>>
    %c0_i32_60 = arith.constant 0 : i32
    %c6_i32 = arith.constant 6 : i32
    %c0_i32_61 = arith.constant 0 : i32
    %61 = tpu.memref_slice %arg2[%60, %c0_i32_61] : memref<10x8xf32, #tpu.memory_space<any>> -> memref<1x8xf32, #tpu.memory_space<any>>
    %c6_i32_62 = arith.constant 6 : i32
    %c0_i32_63 = arith.constant 0 : i32
    %62 = tpu.memref_slice %arg13[%c6_i32_62, %c0_i32_63] : memref<8x8xf32, #tpu.memory_space<vmem>> -> memref<1x8xf32, #tpu.memory_space<vmem>>
    %63 = tpu.memref_slice %arg15[%c0_i32_60, %c6_i32] : memref<2x8x!tpu.dma_semaphore, #tpu.memory_space<semaphore_mem>> -> memref<1x1x!tpu.dma_semaphore, #tpu.memory_space<semaphore_mem>>
    %64 = tpu.memref_squeeze %63 : memref<1x1x!tpu.dma_semaphore, #tpu.memory_space<semaphore_mem>> -> memref<!tpu.dma_semaphore, #tpu.memory_space<semaphore_mem>>
    tpu.enqueue_dma source(%61 : memref<1x8xf32, #tpu.memory_space<any>>) target(%62 : memref<1x8xf32, #tpu.memory_space<vmem>>) target_semaphore(%64 : memref<!tpu.dma_semaphore, #tpu.memory_space<semaphore_mem>>)
    %c6_64 = arith.constant 6 : index
    %65 = memref.load %arg1[%c6_64] : memref<8xi32, #tpu.memory_space<smem>>
    %c1_i32_65 = arith.constant 1 : i32
    %c6_i32_66 = arith.constant 6 : i32
    %c0_i32_67 = arith.constant 0 : i32
    %66 = tpu.memref_slice %arg3[%65, %c0_i32_67] : memref<12x8xf32, #tpu.memory_space<any>> -> memref<1x8xf32, #tpu.memory_space<any>>
    %c6_i32_68 = arith.constant 6 : i32
    %c0_i32_69 = arith.constant 0 : i32
    %67 = tpu.memref_slice %arg14[%c6_i32_68, %c0_i32_69] : memref<8x8xf32, #tpu.memory_space<vmem>> -> memref<1x8xf32, #tpu.memory_space<vmem>>
    %68 = tpu.memref_slice %arg15[%c1_i32_65, %c6_i32_66] : memref<2x8x!tpu.dma_semaphore, #tpu.memory_space<semaphore_mem>> -> memref<1x1x!tpu.dma_semaphore, #tpu.memory_space<semaphore_mem>>
    %69 = tpu.memref_squeeze %68 : memref<1x1x!tpu.dma_semaphore, #tpu.memory_space<semaphore_mem>> -> memref<!tpu.dma_semaphore, #tpu.memory_space<semaphore_mem>>
    tpu.enqueue_dma source(%66 : memref<1x8xf32, #tpu.memory_space<any>>) target(%67 : memref<1x8xf32, #tpu.memory_space<vmem>>) target_semaphore(%69 : memref<!tpu.dma_semaphore, #tpu.memory_space<semaphore_mem>>)
    %c7 = arith.constant 7 : index
    %70 = memref.load %arg0[%c7] : memref<8xi32, #tpu.memory_space<smem>>
    %c0_i32_70 = arith.constant 0 : i32
    %c7_i32 = arith.constant 7 : i32
    %c0_i32_71 = arith.constant 0 : i32
    %71 = tpu.memref_slice %arg2[%70, %c0_i32_71] : memref<10x8xf32, #tpu.memory_space<any>> -> memref<1x8xf32, #tpu.memory_space<any>>
    %c7_i32_72 = arith.constant 7 : i32
    %c0_i32_73 = arith.constant 0 : i32
    %72 = tpu.memref_slice %arg13[%c7_i32_72, %c0_i32_73] : memref<8x8xf32, #tpu.memory_space<vmem>> -> memref<1x8xf32, #tpu.memory_space<vmem>>
    %73 = tpu.memref_slice %arg15[%c0_i32_70, %c7_i32] : memref<2x8x!tpu.dma_semaphore, #tpu.memory_space<semaphore_mem>> -> memref<1x1x!tpu.dma_semaphore, #tpu.memory_space<semaphore_mem>>
    %74 = tpu.memref_squeeze %73 : memref<1x1x!tpu.dma_semaphore, #tpu.memory_space<semaphore_mem>> -> memref<!tpu.dma_semaphore, #tpu.memory_space<semaphore_mem>>
    tpu.enqueue_dma source(%71 : memref<1x8xf32, #tpu.memory_space<any>>) target(%72 : memref<1x8xf32, #tpu.memory_space<vmem>>) target_semaphore(%74 : memref<!tpu.dma_semaphore, #tpu.memory_space<semaphore_mem>>)
    %c7_74 = arith.constant 7 : index
    %75 = memref.load %arg1[%c7_74] : memref<8xi32, #tpu.memory_space<smem>>
    %c1_i32_75 = arith.constant 1 : i32
    %c7_i32_76 = arith.constant 7 : i32
    %c0_i32_77 = arith.constant 0 : i32
    %76 = tpu.memref_slice %arg3[%75, %c0_i32_77] : memref<12x8xf32, #tpu.memory_space<any>> -> memref<1x8xf32, #tpu.memory_space<any>>
    %c7_i32_78 = arith.constant 7 : i32
    %c0_i32_79 = arith.constant 0 : i32
    %77 = tpu.memref_slice %arg14[%c7_i32_78, %c0_i32_79] : memref<8x8xf32, #tpu.memory_space<vmem>> -> memref<1x8xf32, #tpu.memory_space<vmem>>
    %78 = tpu.memref_slice %arg15[%c1_i32_75, %c7_i32_76] : memref<2x8x!tpu.dma_semaphore, #tpu.memory_space<semaphore_mem>> -> memref<1x1x!tpu.dma_semaphore, #tpu.memory_space<semaphore_mem>>
    %79 = tpu.memref_squeeze %78 : memref<1x1x!tpu.dma_semaphore, #tpu.memory_space<semaphore_mem>> -> memref<!tpu.dma_semaphore, #tpu.memory_space<semaphore_mem>>
    tpu.enqueue_dma source(%76 : memref<1x8xf32, #tpu.memory_space<any>>) target(%77 : memref<1x8xf32, #tpu.memory_space<vmem>>) target_semaphore(%79 : memref<!tpu.dma_semaphore, #tpu.memory_space<semaphore_mem>>)
    %c0_i32_80 = arith.constant 0 : i32
    %c0_i32_81 = arith.constant 0 : i32
    %c0_i32_82 = arith.constant 0 : i32
    %c0_i32_83 = arith.constant 0 : i32
    %80 = tpu.memref_slice %arg2[%c0_i32_82, %c0_i32_83] : memref<10x8xf32, #tpu.memory_space<any>> -> memref<1x8xf32, #tpu.memory_space<any>>
    %c0_i32_84 = arith.constant 0 : i32
    %c0_i32_85 = arith.constant 0 : i32
    %81 = tpu.memref_slice %arg13[%c0_i32_84, %c0_i32_85] : memref<8x8xf32, #tpu.memory_space<vmem>> -> memref<1x8xf32, #tpu.memory_space<vmem>>
    %82 = tpu.memref_slice %arg15[%c0_i32_80, %c0_i32_81] : memref<2x8x!tpu.dma_semaphore, #tpu.memory_space<semaphore_mem>> -> memref<1x1x!tpu.dma_semaphore, #tpu.memory_space<semaphore_mem>>
    %83 = tpu.memref_squeeze %82 : memref<1x1x!tpu.dma_semaphore, #tpu.memory_space<semaphore_mem>> -> memref<!tpu.dma_semaphore, #tpu.memory_space<semaphore_mem>>
    tpu.wait_dma2 semaphore(%83 : memref<!tpu.dma_semaphore, #tpu.memory_space<semaphore_mem>>) src(%80 : memref<1x8xf32, #tpu.memory_space<any>>) dst(%81 : memref<1x8xf32, #tpu.memory_space<vmem>>)
    %c1_i32_86 = arith.constant 1 : i32
    %c0_i32_87 = arith.constant 0 : i32
    %c0_i32_88 = arith.constant 0 : i32
    %c0_i32_89 = arith.constant 0 : i32
    %84 = tpu.memref_slice %arg3[%c0_i32_88, %c0_i32_89] : memref<12x8xf32, #tpu.memory_space<any>> -> memref<1x8xf32, #tpu.memory_space<any>>
    %c0_i32_90 = arith.constant 0 : i32
    %c0_i32_91 = arith.constant 0 : i32
    %85 = tpu.memref_slice %arg14[%c0_i32_90, %c0_i32_91] : memref<8x8xf32, #tpu.memory_space<vmem>> -> memref<1x8xf32, #tpu.memory_space<vmem>>
    %86 = tpu.memref_slice %arg15[%c1_i32_86, %c0_i32_87] : memref<2x8x!tpu.dma_semaphore, #tpu.memory_space<semaphore_mem>> -> memref<1x1x!tpu.dma_semaphore, #tpu.memory_space<semaphore_mem>>
    %87 = tpu.memref_squeeze %86 : memref<1x1x!tpu.dma_semaphore, #tpu.memory_space<semaphore_mem>> -> memref<!tpu.dma_semaphore, #tpu.memory_space<semaphore_mem>>
    tpu.wait_dma2 semaphore(%87 : memref<!tpu.dma_semaphore, #tpu.memory_space<semaphore_mem>>) src(%84 : memref<1x8xf32, #tpu.memory_space<any>>) dst(%85 : memref<1x8xf32, #tpu.memory_space<vmem>>)
    %c0_i32_92 = arith.constant 0 : i32
    %c1_i32_93 = arith.constant 1 : i32
    %c0_i32_94 = arith.constant 0 : i32
    %c0_i32_95 = arith.constant 0 : i32
    %88 = tpu.memref_slice %arg2[%c0_i32_94, %c0_i32_95] : memref<10x8xf32, #tpu.memory_space<any>> -> memref<1x8xf32, #tpu.memory_space<any>>
    %c1_i32_96 = arith.constant 1 : i32
    %c0_i32_97 = arith.constant 0 : i32
    %89 = tpu.memref_slice %arg13[%c1_i32_96, %c0_i32_97] : memref<8x8xf32, #tpu.memory_space<vmem>> -> memref<1x8xf32, #tpu.memory_space<vmem>>
    %90 = tpu.memref_slice %arg15[%c0_i32_92, %c1_i32_93] : memref<2x8x!tpu.dma_semaphore, #tpu.memory_space<semaphore_mem>> -> memref<1x1x!tpu.dma_semaphore, #tpu.memory_space<semaphore_mem>>
    %91 = tpu.memref_squeeze %90 : memref<1x1x!tpu.dma_semaphore, #tpu.memory_space<semaphore_mem>> -> memref<!tpu.dma_semaphore, #tpu.memory_space<semaphore_mem>>
    tpu.wait_dma2 semaphore(%91 : memref<!tpu.dma_semaphore, #tpu.memory_space<semaphore_mem>>) src(%88 : memref<1x8xf32, #tpu.memory_space<any>>) dst(%89 : memref<1x8xf32, #tpu.memory_space<vmem>>)
    %c1_i32_98 = arith.constant 1 : i32
    %c1_i32_99 = arith.constant 1 : i32
    %c0_i32_100 = arith.constant 0 : i32
    %c0_i32_101 = arith.constant 0 : i32
    %92 = tpu.memref_slice %arg3[%c0_i32_100, %c0_i32_101] : memref<12x8xf32, #tpu.memory_space<any>> -> memref<1x8xf32, #tpu.memory_space<any>>
    %c1_i32_102 = arith.constant 1 : i32
    %c0_i32_103 = arith.constant 0 : i32
    %93 = tpu.memref_slice %arg14[%c1_i32_102, %c0_i32_103] : memref<8x8xf32, #tpu.memory_space<vmem>> -> memref<1x8xf32, #tpu.memory_space<vmem>>
    %94 = tpu.memref_slice %arg15[%c1_i32_98, %c1_i32_99] : memref<2x8x!tpu.dma_semaphore, #tpu.memory_space<semaphore_mem>> -> memref<1x1x!tpu.dma_semaphore, #tpu.memory_space<semaphore_mem>>
    %95 = tpu.memref_squeeze %94 : memref<1x1x!tpu.dma_semaphore, #tpu.memory_space<semaphore_mem>> -> memref<!tpu.dma_semaphore, #tpu.memory_space<semaphore_mem>>
    tpu.wait_dma2 semaphore(%95 : memref<!tpu.dma_semaphore, #tpu.memory_space<semaphore_mem>>) src(%92 : memref<1x8xf32, #tpu.memory_space<any>>) dst(%93 : memref<1x8xf32, #tpu.memory_space<vmem>>)
    %c0_i32_104 = arith.constant 0 : i32
    %c2_i32_105 = arith.constant 2 : i32
    %c0_i32_106 = arith.constant 0 : i32
    %c0_i32_107 = arith.constant 0 : i32
    %96 = tpu.memref_slice %arg2[%c0_i32_106, %c0_i32_107] : memref<10x8xf32, #tpu.memory_space<any>> -> memref<1x8xf32, #tpu.memory_space<any>>
    %c2_i32_108 = arith.constant 2 : i32
    %c0_i32_109 = arith.constant 0 : i32
    %97 = tpu.memref_slice %arg13[%c2_i32_108, %c0_i32_109] : memref<8x8xf32, #tpu.memory_space<vmem>> -> memref<1x8xf32, #tpu.memory_space<vmem>>
    %98 = tpu.memref_slice %arg15[%c0_i32_104, %c2_i32_105] : memref<2x8x!tpu.dma_semaphore, #tpu.memory_space<semaphore_mem>> -> memref<1x1x!tpu.dma_semaphore, #tpu.memory_space<semaphore_mem>>
    %99 = tpu.memref_squeeze %98 : memref<1x1x!tpu.dma_semaphore, #tpu.memory_space<semaphore_mem>> -> memref<!tpu.dma_semaphore, #tpu.memory_space<semaphore_mem>>
    tpu.wait_dma2 semaphore(%99 : memref<!tpu.dma_semaphore, #tpu.memory_space<semaphore_mem>>) src(%96 : memref<1x8xf32, #tpu.memory_space<any>>) dst(%97 : memref<1x8xf32, #tpu.memory_space<vmem>>)
    %c1_i32_110 = arith.constant 1 : i32
    %c2_i32_111 = arith.constant 2 : i32
    %c0_i32_112 = arith.constant 0 : i32
    %c0_i32_113 = arith.constant 0 : i32
    %100 = tpu.memref_slice %arg3[%c0_i32_112, %c0_i32_113] : memref<12x8xf32, #tpu.memory_space<any>> -> memref<1x8xf32, #tpu.memory_space<any>>
    %c2_i32_114 = arith.constant 2 : i32
    %c0_i32_115 = arith.constant 0 : i32
    %101 = tpu.memref_slice %arg14[%c2_i32_114, %c0_i32_115] : memref<8x8xf32, #tpu.memory_space<vmem>> -> memref<1x8xf32, #tpu.memory_space<vmem>>
    %102 = tpu.memref_slice %arg15[%c1_i32_110, %c2_i32_111] : memref<2x8x!tpu.dma_semaphore, #tpu.memory_space<semaphore_mem>> -> memref<1x1x!tpu.dma_semaphore, #tpu.memory_space<semaphore_mem>>
    %103 = tpu.memref_squeeze %102 : memref<1x1x!tpu.dma_semaphore, #tpu.memory_space<semaphore_mem>> -> memref<!tpu.dma_semaphore, #tpu.memory_space<semaphore_mem>>
    tpu.wait_dma2 semaphore(%103 : memref<!tpu.dma_semaphore, #tpu.memory_space<semaphore_mem>>) src(%100 : memref<1x8xf32, #tpu.memory_space<any>>) dst(%101 : memref<1x8xf32, #tpu.memory_space<vmem>>)
    %c0_i32_116 = arith.constant 0 : i32
    %c3_i32_117 = arith.constant 3 : i32
    %c0_i32_118 = arith.constant 0 : i32
    %c0_i32_119 = arith.constant 0 : i32
    %104 = tpu.memref_slice %arg2[%c0_i32_118, %c0_i32_119] : memref<10x8xf32, #tpu.memory_space<any>> -> memref<1x8xf32, #tpu.memory_space<any>>
    %c3_i32_120 = arith.constant 3 : i32
    %c0_i32_121 = arith.constant 0 : i32
    %105 = tpu.memref_slice %arg13[%c3_i32_120, %c0_i32_121] : memref<8x8xf32, #tpu.memory_space<vmem>> -> memref<1x8xf32, #tpu.memory_space<vmem>>
    %106 = tpu.memref_slice %arg15[%c0_i32_116, %c3_i32_117] : memref<2x8x!tpu.dma_semaphore, #tpu.memory_space<semaphore_mem>> -> memref<1x1x!tpu.dma_semaphore, #tpu.memory_space<semaphore_mem>>
    %107 = tpu.memref_squeeze %106 : memref<1x1x!tpu.dma_semaphore, #tpu.memory_space<semaphore_mem>> -> memref<!tpu.dma_semaphore, #tpu.memory_space<semaphore_mem>>
    tpu.wait_dma2 semaphore(%107 : memref<!tpu.dma_semaphore, #tpu.memory_space<semaphore_mem>>) src(%104 : memref<1x8xf32, #tpu.memory_space<any>>) dst(%105 : memref<1x8xf32, #tpu.memory_space<vmem>>)
    %c1_i32_122 = arith.constant 1 : i32
    %c3_i32_123 = arith.constant 3 : i32
    %c0_i32_124 = arith.constant 0 : i32
    %c0_i32_125 = arith.constant 0 : i32
    %108 = tpu.memref_slice %arg3[%c0_i32_124, %c0_i32_125] : memref<12x8xf32, #tpu.memory_space<any>> -> memref<1x8xf32, #tpu.memory_space<any>>
    %c3_i32_126 = arith.constant 3 : i32
    %c0_i32_127 = arith.constant 0 : i32
    %109 = tpu.memref_slice %arg14[%c3_i32_126, %c0_i32_127] : memref<8x8xf32, #tpu.memory_space<vmem>> -> memref<1x8xf32, #tpu.memory_space<vmem>>
    %110 = tpu.memref_slice %arg15[%c1_i32_122, %c3_i32_123] : memref<2x8x!tpu.dma_semaphore, #tpu.memory_space<semaphore_mem>> -> memref<1x1x!tpu.dma_semaphore, #tpu.memory_space<semaphore_mem>>
    %111 = tpu.memref_squeeze %110 : memref<1x1x!tpu.dma_semaphore, #tpu.memory_space<semaphore_mem>> -> memref<!tpu.dma_semaphore, #tpu.memory_space<semaphore_mem>>
    tpu.wait_dma2 semaphore(%111 : memref<!tpu.dma_semaphore, #tpu.memory_space<semaphore_mem>>) src(%108 : memref<1x8xf32, #tpu.memory_space<any>>) dst(%109 : memref<1x8xf32, #tpu.memory_space<vmem>>)
    %c0_i32_128 = arith.constant 0 : i32
    %c4_i32_129 = arith.constant 4 : i32
    %c0_i32_130 = arith.constant 0 : i32
    %c0_i32_131 = arith.constant 0 : i32
    %112 = tpu.memref_slice %arg2[%c0_i32_130, %c0_i32_131] : memref<10x8xf32, #tpu.memory_space<any>> -> memref<1x8xf32, #tpu.memory_space<any>>
    %c4_i32_132 = arith.constant 4 : i32
    %c0_i32_133 = arith.constant 0 : i32
    %113 = tpu.memref_slice %arg13[%c4_i32_132, %c0_i32_133] : memref<8x8xf32, #tpu.memory_space<vmem>> -> memref<1x8xf32, #tpu.memory_space<vmem>>
    %114 = tpu.memref_slice %arg15[%c0_i32_128, %c4_i32_129] : memref<2x8x!tpu.dma_semaphore, #tpu.memory_space<semaphore_mem>> -> memref<1x1x!tpu.dma_semaphore, #tpu.memory_space<semaphore_mem>>
    %115 = tpu.memref_squeeze %114 : memref<1x1x!tpu.dma_semaphore, #tpu.memory_space<semaphore_mem>> -> memref<!tpu.dma_semaphore, #tpu.memory_space<semaphore_mem>>
    tpu.wait_dma2 semaphore(%115 : memref<!tpu.dma_semaphore, #tpu.memory_space<semaphore_mem>>) src(%112 : memref<1x8xf32, #tpu.memory_space<any>>) dst(%113 : memref<1x8xf32, #tpu.memory_space<vmem>>)
    %c1_i32_134 = arith.constant 1 : i32
    %c4_i32_135 = arith.constant 4 : i32
    %c0_i32_136 = arith.constant 0 : i32
    %c0_i32_137 = arith.constant 0 : i32
    %116 = tpu.memref_slice %arg3[%c0_i32_136, %c0_i32_137] : memref<12x8xf32, #tpu.memory_space<any>> -> memref<1x8xf32, #tpu.memory_space<any>>
    %c4_i32_138 = arith.constant 4 : i32
    %c0_i32_139 = arith.constant 0 : i32
    %117 = tpu.memref_slice %arg14[%c4_i32_138, %c0_i32_139] : memref<8x8xf32, #tpu.memory_space<vmem>> -> memref<1x8xf32, #tpu.memory_space<vmem>>
    %118 = tpu.memref_slice %arg15[%c1_i32_134, %c4_i32_135] : memref<2x8x!tpu.dma_semaphore, #tpu.memory_space<semaphore_mem>> -> memref<1x1x!tpu.dma_semaphore, #tpu.memory_space<semaphore_mem>>
    %119 = tpu.memref_squeeze %118 : memref<1x1x!tpu.dma_semaphore, #tpu.memory_space<semaphore_mem>> -> memref<!tpu.dma_semaphore, #tpu.memory_space<semaphore_mem>>
    tpu.wait_dma2 semaphore(%119 : memref<!tpu.dma_semaphore, #tpu.memory_space<semaphore_mem>>) src(%116 : memref<1x8xf32, #tpu.memory_space<any>>) dst(%117 : memref<1x8xf32, #tpu.memory_space<vmem>>)
    %c0_i32_140 = arith.constant 0 : i32
    %c5_i32_141 = arith.constant 5 : i32
    %c0_i32_142 = arith.constant 0 : i32
    %c0_i32_143 = arith.constant 0 : i32
    %120 = tpu.memref_slice %arg2[%c0_i32_142, %c0_i32_143] : memref<10x8xf32, #tpu.memory_space<any>> -> memref<1x8xf32, #tpu.memory_space<any>>
    %c5_i32_144 = arith.constant 5 : i32
    %c0_i32_145 = arith.constant 0 : i32
    %121 = tpu.memref_slice %arg13[%c5_i32_144, %c0_i32_145] : memref<8x8xf32, #tpu.memory_space<vmem>> -> memref<1x8xf32, #tpu.memory_space<vmem>>
    %122 = tpu.memref_slice %arg15[%c0_i32_140, %c5_i32_141] : memref<2x8x!tpu.dma_semaphore, #tpu.memory_space<semaphore_mem>> -> memref<1x1x!tpu.dma_semaphore, #tpu.memory_space<semaphore_mem>>
    %123 = tpu.memref_squeeze %122 : memref<1x1x!tpu.dma_semaphore, #tpu.memory_space<semaphore_mem>> -> memref<!tpu.dma_semaphore, #tpu.memory_space<semaphore_mem>>
    tpu.wait_dma2 semaphore(%123 : memref<!tpu.dma_semaphore, #tpu.memory_space<semaphore_mem>>) src(%120 : memref<1x8xf32, #tpu.memory_space<any>>) dst(%121 : memref<1x8xf32, #tpu.memory_space<vmem>>)
    %c1_i32_146 = arith.constant 1 : i32
    %c5_i32_147 = arith.constant 5 : i32
    %c0_i32_148 = arith.constant 0 : i32
    %c0_i32_149 = arith.constant 0 : i32
    %124 = tpu.memref_slice %arg3[%c0_i32_148, %c0_i32_149] : memref<12x8xf32, #tpu.memory_space<any>> -> memref<1x8xf32, #tpu.memory_space<any>>
    %c5_i32_150 = arith.constant 5 : i32
    %c0_i32_151 = arith.constant 0 : i32
    %125 = tpu.memref_slice %arg14[%c5_i32_150, %c0_i32_151] : memref<8x8xf32, #tpu.memory_space<vmem>> -> memref<1x8xf32, #tpu.memory_space<vmem>>
    %126 = tpu.memref_slice %arg15[%c1_i32_146, %c5_i32_147] : memref<2x8x!tpu.dma_semaphore, #tpu.memory_space<semaphore_mem>> -> memref<1x1x!tpu.dma_semaphore, #tpu.memory_space<semaphore_mem>>
    %127 = tpu.memref_squeeze %126 : memref<1x1x!tpu.dma_semaphore, #tpu.memory_space<semaphore_mem>> -> memref<!tpu.dma_semaphore, #tpu.memory_space<semaphore_mem>>
    tpu.wait_dma2 semaphore(%127 : memref<!tpu.dma_semaphore, #tpu.memory_space<semaphore_mem>>) src(%124 : memref<1x8xf32, #tpu.memory_space<any>>) dst(%125 : memref<1x8xf32, #tpu.memory_space<vmem>>)
    %c0_i32_152 = arith.constant 0 : i32
    %c6_i32_153 = arith.constant 6 : i32
    %c0_i32_154 = arith.constant 0 : i32
    %c0_i32_155 = arith.constant 0 : i32
    %128 = tpu.memref_slice %arg2[%c0_i32_154, %c0_i32_155] : memref<10x8xf32, #tpu.memory_space<any>> -> memref<1x8xf32, #tpu.memory_space<any>>
    %c6_i32_156 = arith.constant 6 : i32
    %c0_i32_157 = arith.constant 0 : i32
    %129 = tpu.memref_slice %arg13[%c6_i32_156, %c0_i32_157] : memref<8x8xf32, #tpu.memory_space<vmem>> -> memref<1x8xf32, #tpu.memory_space<vmem>>
    %130 = tpu.memref_slice %arg15[%c0_i32_152, %c6_i32_153] : memref<2x8x!tpu.dma_semaphore, #tpu.memory_space<semaphore_mem>> -> memref<1x1x!tpu.dma_semaphore, #tpu.memory_space<semaphore_mem>>
    %131 = tpu.memref_squeeze %130 : memref<1x1x!tpu.dma_semaphore, #tpu.memory_space<semaphore_mem>> -> memref<!tpu.dma_semaphore, #tpu.memory_space<semaphore_mem>>
    tpu.wait_dma2 semaphore(%131 : memref<!tpu.dma_semaphore, #tpu.memory_space<semaphore_mem>>) src(%128 : memref<1x8xf32, #tpu.memory_space<any>>) dst(%129 : memref<1x8xf32, #tpu.memory_space<vmem>>)
    %c1_i32_158 = arith.constant 1 : i32
    %c6_i32_159 = arith.constant 6 : i32
    %c0_i32_160 = arith.constant 0 : i32
    %c0_i32_161 = arith.constant 0 : i32
    %132 = tpu.memref_slice %arg3[%c0_i32_160, %c0_i32_161] : memref<12x8xf32, #tpu.memory_space<any>> -> memref<1x8xf32, #tpu.memory_space<any>>
    %c6_i32_162 = arith.constant 6 : i32
    %c0_i32_163 = arith.constant 0 : i32
    %133 = tpu.memref_slice %arg14[%c6_i32_162, %c0_i32_163] : memref<8x8xf32, #tpu.memory_space<vmem>> -> memref<1x8xf32, #tpu.memory_space<vmem>>
    %134 = tpu.memref_slice %arg15[%c1_i32_158, %c6_i32_159] : memref<2x8x!tpu.dma_semaphore, #tpu.memory_space<semaphore_mem>> -> memref<1x1x!tpu.dma_semaphore, #tpu.memory_space<semaphore_mem>>
    %135 = tpu.memref_squeeze %134 : memref<1x1x!tpu.dma_semaphore, #tpu.memory_space<semaphore_mem>> -> memref<!tpu.dma_semaphore, #tpu.memory_space<semaphore_mem>>
    tpu.wait_dma2 semaphore(%135 : memref<!tpu.dma_semaphore, #tpu.memory_space<semaphore_mem>>) src(%132 : memref<1x8xf32, #tpu.memory_space<any>>) dst(%133 : memref<1x8xf32, #tpu.memory_space<vmem>>)
    %c0_i32_164 = arith.constant 0 : i32
    %c7_i32_165 = arith.constant 7 : i32
    %c0_i32_166 = arith.constant 0 : i32
    %c0_i32_167 = arith.constant 0 : i32
    %136 = tpu.memref_slice %arg2[%c0_i32_166, %c0_i32_167] : memref<10x8xf32, #tpu.memory_space<any>> -> memref<1x8xf32, #tpu.memory_space<any>>
    %c7_i32_168 = arith.constant 7 : i32
    %c0_i32_169 = arith.constant 0 : i32
    %137 = tpu.memref_slice %arg13[%c7_i32_168, %c0_i32_169] : memref<8x8xf32, #tpu.memory_space<vmem>> -> memref<1x8xf32, #tpu.memory_space<vmem>>
    %138 = tpu.memref_slice %arg15[%c0_i32_164, %c7_i32_165] : memref<2x8x!tpu.dma_semaphore, #tpu.memory_space<semaphore_mem>> -> memref<1x1x!tpu.dma_semaphore, #tpu.memory_space<semaphore_mem>>
    %139 = tpu.memref_squeeze %138 : memref<1x1x!tpu.dma_semaphore, #tpu.memory_space<semaphore_mem>> -> memref<!tpu.dma_semaphore, #tpu.memory_space<semaphore_mem>>
    tpu.wait_dma2 semaphore(%139 : memref<!tpu.dma_semaphore, #tpu.memory_space<semaphore_mem>>) src(%136 : memref<1x8xf32, #tpu.memory_space<any>>) dst(%137 : memref<1x8xf32, #tpu.memory_space<vmem>>)
    %c1_i32_170 = arith.constant 1 : i32
    %c7_i32_171 = arith.constant 7 : i32
    %c0_i32_172 = arith.constant 0 : i32
    %c0_i32_173 = arith.constant 0 : i32
    %140 = tpu.memref_slice %arg3[%c0_i32_172, %c0_i32_173] : memref<12x8xf32, #tpu.memory_space<any>> -> memref<1x8xf32, #tpu.memory_space<any>>
    %c7_i32_174 = arith.constant 7 : i32
    %c0_i32_175 = arith.constant 0 : i32
    %141 = tpu.memref_slice %arg14[%c7_i32_174, %c0_i32_175] : memref<8x8xf32, #tpu.memory_space<vmem>> -> memref<1x8xf32, #tpu.memory_space<vmem>>
    %142 = tpu.memref_slice %arg15[%c1_i32_170, %c7_i32_171] : memref<2x8x!tpu.dma_semaphore, #tpu.memory_space<semaphore_mem>> -> memref<1x1x!tpu.dma_semaphore, #tpu.memory_space<semaphore_mem>>
    %143 = tpu.memref_squeeze %142 : memref<1x1x!tpu.dma_semaphore, #tpu.memory_space<semaphore_mem>> -> memref<!tpu.dma_semaphore, #tpu.memory_space<semaphore_mem>>
    tpu.wait_dma2 semaphore(%143 : memref<!tpu.dma_semaphore, #tpu.memory_space<semaphore_mem>>) src(%140 : memref<1x8xf32, #tpu.memory_space<any>>) dst(%141 : memref<1x8xf32, #tpu.memory_space<vmem>>)
    %c0_176 = arith.constant 0 : index
    %c0_177 = arith.constant 0 : index
    %144 = vector.load %arg13[%c0_176, %c0_177] : memref<8x8xf32, #tpu.memory_space<vmem>>, vector<8x8xf32>
    %c0_178 = arith.constant 0 : index
    %c0_179 = arith.constant 0 : index
    %145 = vector.load %arg14[%c0_178, %c0_179] : memref<8x8xf32, #tpu.memory_space<vmem>>, vector<8x8xf32>
    %146 = tpu.concatenate %144, %145 in 1 : vector<8x8xf32>, vector<8x8xf32> -> vector<8x16xf32>
    %c0_180 = arith.constant 0 : index
    %c0_181 = arith.constant 0 : index
    %147 = vector.load %arg4[%c0_180, %c0_181] : memref<11x256xf32, #tpu.memory_space<vmem>>, vector<11x256xf32>
    %148 = tpu.concatenate %146, %146 in 1 : vector<8x16xf32>, vector<8x16xf32> -> vector<8x32xf32>
    %149 = tpu.concatenate %148, %148 in 1 : vector<8x32xf32>, vector<8x32xf32> -> vector<8x64xf32>
    %150 = tpu.concatenate %149, %149 in 1 : vector<8x64xf32>, vector<8x64xf32> -> vector<8x128xf32>
    %151 = tpu.concatenate %150, %150 in 1 : vector<8x128xf32>, vector<8x128xf32> -> vector<8x256xf32>
    %152 = vector.extract_strided_slice %147 {offsets = [0, 0], sizes = [1, 256], strides = [1, 1]} : vector<11x256xf32> to vector<1x256xf32>
    %153 = vector.broadcast %152 : vector<1x256xf32> to vector<8x256xf32>
    %154 = arith.cmpf oge, %151, %153 : vector<8x256xf32>
    %155 = vector.extract_strided_slice %147 {offsets = [1, 0], sizes = [1, 256], strides = [1, 1]} : vector<11x256xf32> to vector<1x256xf32>
    %156 = vector.broadcast %155 : vector<1x256xf32> to vector<8x256xf32>
    %157 = arith.cmpf olt, %151, %156 : vector<8x256xf32>
    %158 = arith.andi %154, %157 : vector<8x256xi1>
    %cst = arith.constant 1.000000e+00 : f32
    %cst_182 = arith.constant 0.000000e+00 : f32
    %159 = vector.broadcast %cst : f32 to vector<8x256xf32>
    %160 = vector.broadcast %cst_182 : f32 to vector<8x256xf32>
    %161 = arith.select %158, %159, %160 : vector<8x256xi1>, vector<8x256xf32>
    %162 = vector.extract_strided_slice %147 {offsets = [2, 0], sizes = [1, 256], strides = [1, 1]} : vector<11x256xf32> to vector<1x256xf32>
    %163 = vector.extract_strided_slice %147 {offsets = [3, 0], sizes = [1, 256], strides = [1, 1]} : vector<11x256xf32> to vector<1x256xf32>
    %164 = vector.extract_strided_slice %147 {offsets = [4, 0], sizes = [1, 256], strides = [1, 1]} : vector<11x256xf32> to vector<1x256xf32>
    %165 = vector.broadcast %152 : vector<1x256xf32> to vector<8x256xf32>
    %166 = arith.subf %151, %165 : vector<8x256xf32>
    %167 = vector.broadcast %163 : vector<1x256xf32> to vector<8x256xf32>
    %168 = arith.mulf %166, %167 : vector<8x256xf32>
    %169 = vector.broadcast %162 : vector<1x256xf32> to vector<8x256xf32>
    %170 = arith.subf %169, %151 : vector<8x256xf32>
    %171 = vector.broadcast %164 : vector<1x256xf32> to vector<8x256xf32>
    %172 = arith.mulf %170, %171 : vector<8x256xf32>
    %173 = arith.mulf %168, %161 : vector<8x256xf32>
    %c240_i32 = arith.constant 240 : i32
    %174 = tpu.dynamic_rotate %161 by %c240_i32 dim 1 : vector<8x256xf32>, i32 -> vector<8x256xf32>
    %175 = arith.mulf %172, %174 : vector<8x256xf32>
    %176 = arith.addf %173, %175 : vector<8x256xf32>
    %177 = vector.extract_strided_slice %147 {offsets = [5, 0], sizes = [1, 256], strides = [1, 1]} : vector<11x256xf32> to vector<1x256xf32>
    %178 = vector.extract_strided_slice %147 {offsets = [6, 0], sizes = [1, 256], strides = [1, 1]} : vector<11x256xf32> to vector<1x256xf32>
    %179 = vector.extract_strided_slice %147 {offsets = [7, 0], sizes = [1, 256], strides = [1, 1]} : vector<11x256xf32> to vector<1x256xf32>
    %180 = vector.broadcast %152 : vector<1x256xf32> to vector<8x256xf32>
    %181 = arith.subf %151, %180 : vector<8x256xf32>
    %182 = vector.broadcast %178 : vector<1x256xf32> to vector<8x256xf32>
    %183 = arith.mulf %181, %182 : vector<8x256xf32>
    %184 = vector.broadcast %177 : vector<1x256xf32> to vector<8x256xf32>
    %185 = arith.subf %184, %151 : vector<8x256xf32>
    %186 = vector.broadcast %179 : vector<1x256xf32> to vector<8x256xf32>
    %187 = arith.mulf %185, %186 : vector<8x256xf32>
    %188 = arith.mulf %183, %176 : vector<8x256xf32>
    %c240_i32_183 = arith.constant 240 : i32
    %189 = tpu.dynamic_rotate %176 by %c240_i32_183 dim 1 : vector<8x256xf32>, i32 -> vector<8x256xf32>
    %190 = arith.mulf %187, %189 : vector<8x256xf32>
    %191 = arith.addf %188, %190 : vector<8x256xf32>
    %192 = vector.extract_strided_slice %147 {offsets = [8, 0], sizes = [1, 256], strides = [1, 1]} : vector<11x256xf32> to vector<1x256xf32>
    %193 = vector.extract_strided_slice %147 {offsets = [9, 0], sizes = [1, 256], strides = [1, 1]} : vector<11x256xf32> to vector<1x256xf32>
    %194 = vector.extract_strided_slice %147 {offsets = [10, 0], sizes = [1, 256], strides = [1, 1]} : vector<11x256xf32> to vector<1x256xf32>
    %195 = vector.broadcast %152 : vector<1x256xf32> to vector<8x256xf32>
    %196 = arith.subf %151, %195 : vector<8x256xf32>
    %197 = vector.broadcast %193 : vector<1x256xf32> to vector<8x256xf32>
    %198 = arith.mulf %196, %197 : vector<8x256xf32>
    %199 = vector.broadcast %192 : vector<1x256xf32> to vector<8x256xf32>
    %200 = arith.subf %199, %151 : vector<8x256xf32>
    %201 = vector.broadcast %194 : vector<1x256xf32> to vector<8x256xf32>
    %202 = arith.mulf %200, %201 : vector<8x256xf32>
    %203 = arith.mulf %198, %191 : vector<8x256xf32>
    %c240_i32_184 = arith.constant 240 : i32
    %204 = tpu.dynamic_rotate %191 by %c240_i32_184 dim 1 : vector<8x256xf32>, i32 -> vector<8x256xf32>
    %205 = arith.mulf %202, %204 : vector<8x256xf32>
    %206 = arith.addf %203, %205 : vector<8x256xf32>
    %207 = arith.negf %146 : vector<8x16xf32>
    %208 = math.exp %207 : vector<8x16xf32>
    %cst_185 = arith.constant 1.000000e+00 : f32
    %209 = vector.broadcast %cst_185 : f32 to vector<8x16xf32>
    %210 = arith.addf %209, %208 : vector<8x16xf32>
    %211 = arith.divf %209, %210 : vector<8x16xf32>
    %212 = arith.mulf %146, %211 : vector<8x16xf32>
    %213 = arith.truncf %206 : vector<8x256xf32> to vector<8x256xbf16>
    %c0_186 = arith.constant 0 : index
    %c0_187 = arith.constant 0 : index
    %214 = vector.load %arg5[%c0_186, %c0_187] : memref<256x32xbf16, #tpu.memory_space<vmem>>, vector<256x32xbf16>
    %cst_188 = arith.constant dense<0.000000e+00> : vector<8x32xf32>
    %215 = tpu.matmul %213, %214, %cst_188 {dimension_numbers = #tpu.dot_dimension_numbers<[1], [0], [0], [1], [0, 0, 1, 1], [], []>} : vector<8x256xbf16>, vector<256x32xbf16>, vector<8x32xf32> -> vector<8x32xf32>
    %216 = arith.truncf %212 : vector<8x16xf32> to vector<8x16xbf16>
    %c0_189 = arith.constant 0 : index
    %c0_190 = arith.constant 0 : index
    %217 = vector.load %arg6[%c0_189, %c0_190] : memref<16x32xbf16, #tpu.memory_space<vmem>>, vector<16x32xbf16>
    %cst_191 = arith.constant dense<0.000000e+00> : vector<8x32xf32>
    %218 = tpu.matmul %216, %217, %cst_191 {dimension_numbers = #tpu.dot_dimension_numbers<[1], [0], [0], [1], [0, 0, 1, 1], [], []>} : vector<8x16xbf16>, vector<16x32xbf16>, vector<8x32xf32> -> vector<8x32xf32>
    %219 = arith.addf %215, %218 : vector<8x32xf32>
    %c0_192 = arith.constant 0 : index
    %c0_193 = arith.constant 0 : index
    %220 = vector.load %arg7[%c0_192, %c0_193] : memref<1x32xf32, #tpu.memory_space<vmem>>, vector<1x32xf32>
    %221 = vector.broadcast %220 : vector<1x32xf32> to vector<8x32xf32>
    %222 = arith.addf %219, %221 : vector<8x32xf32>
    %c0_194 = arith.constant 0 : index
    %c0_195 = arith.constant 0 : index
    %223 = vector.load %arg8[%c0_194, %c0_195] : memref<11x384xf32, #tpu.memory_space<vmem>>, vector<11x384xf32>
    %224 = tpu.concatenate %222, %222 in 1 : vector<8x32xf32>, vector<8x32xf32> -> vector<8x64xf32>
    %225 = tpu.concatenate %224, %224 in 1 : vector<8x64xf32>, vector<8x64xf32> -> vector<8x128xf32>
    %226 = tpu.concatenate %225, %225 in 1 : vector<8x128xf32>, vector<8x128xf32> -> vector<8x256xf32>
    %227 = tpu.concatenate %225, %226 in 1 : vector<8x128xf32>, vector<8x256xf32> -> vector<8x384xf32>
    %228 = vector.extract_strided_slice %223 {offsets = [0, 0], sizes = [1, 384], strides = [1, 1]} : vector<11x384xf32> to vector<1x384xf32>
    %229 = vector.broadcast %228 : vector<1x384xf32> to vector<8x384xf32>
    %230 = arith.cmpf oge, %227, %229 : vector<8x384xf32>
    %231 = vector.extract_strided_slice %223 {offsets = [1, 0], sizes = [1, 384], strides = [1, 1]} : vector<11x384xf32> to vector<1x384xf32>
    %232 = vector.broadcast %231 : vector<1x384xf32> to vector<8x384xf32>
    %233 = arith.cmpf olt, %227, %232 : vector<8x384xf32>
    %234 = arith.andi %230, %233 : vector<8x384xi1>
    %cst_196 = arith.constant 1.000000e+00 : f32
    %cst_197 = arith.constant 0.000000e+00 : f32
    %235 = vector.broadcast %cst_196 : f32 to vector<8x384xf32>
    %236 = vector.broadcast %cst_197 : f32 to vector<8x384xf32>
    %237 = arith.select %234, %235, %236 : vector<8x384xi1>, vector<8x384xf32>
    %238 = vector.extract_strided_slice %223 {offsets = [2, 0], sizes = [1, 384], strides = [1, 1]} : vector<11x384xf32> to vector<1x384xf32>
    %239 = vector.extract_strided_slice %223 {offsets = [3, 0], sizes = [1, 384], strides = [1, 1]} : vector<11x384xf32> to vector<1x384xf32>
    %240 = vector.extract_strided_slice %223 {offsets = [4, 0], sizes = [1, 384], strides = [1, 1]} : vector<11x384xf32> to vector<1x384xf32>
    %241 = vector.broadcast %228 : vector<1x384xf32> to vector<8x384xf32>
    %242 = arith.subf %227, %241 : vector<8x384xf32>
    %243 = vector.broadcast %239 : vector<1x384xf32> to vector<8x384xf32>
    %244 = arith.mulf %242, %243 : vector<8x384xf32>
    %245 = vector.broadcast %238 : vector<1x384xf32> to vector<8x384xf32>
    %246 = arith.subf %245, %227 : vector<8x384xf32>
    %247 = vector.broadcast %240 : vector<1x384xf32> to vector<8x384xf32>
    %248 = arith.mulf %246, %247 : vector<8x384xf32>
    %249 = arith.mulf %244, %237 : vector<8x384xf32>
    %c352_i32 = arith.constant 352 : i32
    %250 = tpu.dynamic_rotate %237 by %c352_i32 dim 1 : vector<8x384xf32>, i32 -> vector<8x384xf32>
    %251 = arith.mulf %248, %250 : vector<8x384xf32>
    %252 = arith.addf %249, %251 : vector<8x384xf32>
    %253 = vector.extract_strided_slice %223 {offsets = [5, 0], sizes = [1, 384], strides = [1, 1]} : vector<11x384xf32> to vector<1x384xf32>
    %254 = vector.extract_strided_slice %223 {offsets = [6, 0], sizes = [1, 384], strides = [1, 1]} : vector<11x384xf32> to vector<1x384xf32>
    %255 = vector.extract_strided_slice %223 {offsets = [7, 0], sizes = [1, 384], strides = [1, 1]} : vector<11x384xf32> to vector<1x384xf32>
    %256 = vector.broadcast %228 : vector<1x384xf32> to vector<8x384xf32>
    %257 = arith.subf %227, %256 : vector<8x384xf32>
    %258 = vector.broadcast %254 : vector<1x384xf32> to vector<8x384xf32>
    %259 = arith.mulf %257, %258 : vector<8x384xf32>
    %260 = vector.broadcast %253 : vector<1x384xf32> to vector<8x384xf32>
    %261 = arith.subf %260, %227 : vector<8x384xf32>
    %262 = vector.broadcast %255 : vector<1x384xf32> to vector<8x384xf32>
    %263 = arith.mulf %261, %262 : vector<8x384xf32>
    %264 = arith.mulf %259, %252 : vector<8x384xf32>
    %c352_i32_198 = arith.constant 352 : i32
    %265 = tpu.dynamic_rotate %252 by %c352_i32_198 dim 1 : vector<8x384xf32>, i32 -> vector<8x384xf32>
    %266 = arith.mulf %263, %265 : vector<8x384xf32>
    %267 = arith.addf %264, %266 : vector<8x384xf32>
    %268 = vector.extract_strided_slice %223 {offsets = [8, 0], sizes = [1, 384], strides = [1, 1]} : vector<11x384xf32> to vector<1x384xf32>
    %269 = vector.extract_strided_slice %223 {offsets = [9, 0], sizes = [1, 384], strides = [1, 1]} : vector<11x384xf32> to vector<1x384xf32>
    %270 = vector.extract_strided_slice %223 {offsets = [10, 0], sizes = [1, 384], strides = [1, 1]} : vector<11x384xf32> to vector<1x384xf32>
    %271 = vector.broadcast %228 : vector<1x384xf32> to vector<8x384xf32>
    %272 = arith.subf %227, %271 : vector<8x384xf32>
    %273 = vector.broadcast %269 : vector<1x384xf32> to vector<8x384xf32>
    %274 = arith.mulf %272, %273 : vector<8x384xf32>
    %275 = vector.broadcast %268 : vector<1x384xf32> to vector<8x384xf32>
    %276 = arith.subf %275, %227 : vector<8x384xf32>
    %277 = vector.broadcast %270 : vector<1x384xf32> to vector<8x384xf32>
    %278 = arith.mulf %276, %277 : vector<8x384xf32>
    %279 = arith.mulf %274, %267 : vector<8x384xf32>
    %c352_i32_199 = arith.constant 352 : i32
    %280 = tpu.dynamic_rotate %267 by %c352_i32_199 dim 1 : vector<8x384xf32>, i32 -> vector<8x384xf32>
    %281 = arith.mulf %278, %280 : vector<8x384xf32>
    %282 = arith.addf %279, %281 : vector<8x384xf32>
    %283 = arith.negf %222 : vector<8x32xf32>
    %284 = math.exp %283 : vector<8x32xf32>
    %cst_200 = arith.constant 1.000000e+00 : f32
    %285 = vector.broadcast %cst_200 : f32 to vector<8x32xf32>
    %286 = arith.addf %285, %284 : vector<8x32xf32>
    %287 = arith.divf %285, %286 : vector<8x32xf32>
    %288 = arith.mulf %222, %287 : vector<8x32xf32>
    %289 = arith.truncf %282 : vector<8x384xf32> to vector<8x384xbf16>
    %c0_201 = arith.constant 0 : index
    %c0_202 = arith.constant 0 : index
    %290 = vector.load %arg9[%c0_201, %c0_202] : memref<384x128xbf16, #tpu.memory_space<vmem>>, vector<384x128xbf16>
    %cst_203 = arith.constant dense<0.000000e+00> : vector<8x128xf32>
    %291 = tpu.matmul %289, %290, %cst_203 {dimension_numbers = #tpu.dot_dimension_numbers<[1], [0], [0], [1], [0, 0, 1, 1], [], []>} : vector<8x384xbf16>, vector<384x128xbf16>, vector<8x128xf32> -> vector<8x128xf32>
    %292 = arith.truncf %288 : vector<8x32xf32> to vector<8x32xbf16>
    %c0_204 = arith.constant 0 : index
    %c0_205 = arith.constant 0 : index
    %293 = vector.load %arg10[%c0_204, %c0_205] : memref<32x128xbf16, #tpu.memory_space<vmem>>, vector<32x128xbf16>
    %cst_206 = arith.constant dense<0.000000e+00> : vector<8x128xf32>
    %294 = tpu.matmul %292, %293, %cst_206 {dimension_numbers = #tpu.dot_dimension_numbers<[1], [0], [0], [1], [0, 0, 1, 1], [], []>} : vector<8x32xbf16>, vector<32x128xbf16>, vector<8x128xf32> -> vector<8x128xf32>
    %295 = arith.addf %291, %294 : vector<8x128xf32>
    %c0_207 = arith.constant 0 : index
    %c0_208 = arith.constant 0 : index
    %296 = vector.load %arg11[%c0_207, %c0_208] : memref<1x128xf32, #tpu.memory_space<vmem>>, vector<1x128xf32>
    %297 = vector.broadcast %296 : vector<1x128xf32> to vector<8x128xf32>
    %298 = arith.addf %295, %297 : vector<8x128xf32>
    %299 = arith.negf %298 : vector<8x128xf32>
    %300 = math.exp %299 : vector<8x128xf32>
    %cst_209 = arith.constant 1.000000e+00 : f32
    %301 = vector.broadcast %cst_209 : f32 to vector<8x128xf32>
    %302 = arith.addf %301, %300 : vector<8x128xf32>
    %303 = arith.divf %301, %302 : vector<8x128xf32>
    %c0_210 = arith.constant 0 : index
    %c0_211 = arith.constant 0 : index
    %304 = vector.load %arg12[%c0_210, %c0_211] : memref<8x128xf32, #tpu.memory_space<vmem>>, vector<8x128xf32>
    tpu.vector_store %arg12[%c0_210, %c0_211], %303 {strides = array<i32>} : memref<8x128xf32, #tpu.memory_space<vmem>>, vector<8x128xf32>,
    return
  }
}

</mosaic_0001>

<bundles_post_ra>
// kernel: _lambda_.1
= control target key start
LH: loop header
LB: loop body
LE: loop exit
PB: predicated region body
PF: predicated region fallthrough
CT: control target
= control target key end

     0   :  { %17 = vsyncpa [#allocation7], 0  ;;  %s3297_s0 = inlined_call_operand.vmem [shape: s32[8], index: 0, kind: input, shape index: {}]   ;;  %s3298_s1 = inlined_call_operand.vmem [shape: s32[8], index: 1, kind: input, shape index: {}]   ;;  %s3299_s2 = inlined_call_operand.vmem [shape: f32[10,8], index: 2, kind: input, shape index: {}]   ;;  %s3300_s3 = inlined_call_operand.vmem [shape: f32[12,8], index: 3, kind: input, shape index: {}]   ;;  %s3301_s4 = inlined_call_operand.hbm [shape: f32[11,256], index: 4, kind: input, shape index: {}]   ;;  %s3302_s5 = inlined_call_operand.vmem [shape: bf16[256,32], index: 5, kind: input, shape index: {}]   ;;  %s3303_s6 = inlined_call_operand.hbm [shape: bf16[16,32], index: 6, kind: input, shape index: {}]   ;;  %s3304_s7 = inlined_call_operand.hbm [shape: f32[1,32], index: 7, kind: input, shape index: {}]   ;;  %s3305_s8 = inlined_call_operand.vmem [shape: f32[11,384], index: 8, kind: input, shape index: {}]   ;;  %s3306_s9 = inlined_call_operand.vmem [shape: bf16[384,128], index: 9, kind: input, shape index: {}]   ;;  %s3307_s10 = inlined_call_operand.hbm [shape: bf16[32,128], index: 10, kind: input, shape index: {}]   ;;  %s3308_s11 = inlined_call_operand.hbm [shape: f32[1,128], index: 11, kind: input, shape index: {}]   ;;  %s3309_s12 = inlined_call_operand.vmem [shape: f32[8,128], index: 12, kind: output, shape index: {}]  }
   0x1   :  { %18 = vsyncpa [#allocation9], 0 }
   0x2   :  { %19 = vsyncpa [#allocation6], 0 }
   0x3   :  { %20 = vsyncpa [#allocation12], 0 }
   0x4   :  { %21 = vsyncpa [#allocation15], 0  ;;  %s2689_s21 = smov [#allocation11]   ;;  %s2513_s25 = scalar_lea.hbm %s3303_s6, 128 }
   0x5   :  { %s61_s22 = sshll.u32 %s2689_s21, 4  ;;  %p2514_p0 = scmp.ne.s32.totalorder %s3303_s6, %s2513_s25  ;;  %s62_s22 = int_to_ptr.vmem [resolvable:$true] %s61_s22 }
   0x6   :  { %p2517_p1 = scmp.lt.u32.totalorder %s2513_s25, %s3303_s6 }
   0x8   :  { %p2519_p2 = pnand %p2517_p1, %p2514_p0 }
   0xa   :  { %2522 = shalt.err (!%p2519_p2)
}
   0xb   :  { %s2523_s30 = scalar_lea.vmem %s62_s22, 128  ;;  %p2528_p4 = scmp.lt.s32.totalorder %s62_s22, %s62_s22 }
   0xc   :  { %p2524_p3 = scmp.ne.s32.totalorder %s62_s22, %s2523_s30  ;;  %p2529_p5 = scmp.lt.s32.totalorder %s2523_s30, %s2523_s30 }
   0xe   :  { %p2530_p6 = por %p2529_p5, %p2528_p4 }
  0x10   :  { %p2531_p7 = pnand %p2530_p6, %p2524_p3 }
  0x12   :  { %2534 = shalt.err (!%p2531_p7)
}
  0x13   :  { %s2690_s13 = smov 64   ;;  %s2691_s14 = smov 4  }
  0x14   :  { %67 = dma.hbm_to_vmem [thread:$0]  %s3303_s6, 128, %s62_s22, [#allocation12], %s2690_s13, %s2690_s13, %s2691_s14  }
  0x15   :  { %s2692_s17 = smov [#allocation14]   ;;  %s28_s21 = sshll.u32 %s3297_s0, 4  ;;  %s29_s21 = int_to_ptr.vmem [resolvable:$true] %s28_s21 }
  0x16   :  { %s87_s18 = sshll.u32 %s2692_s17, 4  ;;  %s2535_s25 = scalar_lea.hbm %s3307_s10, 256  ;;  %s88_s18 = int_to_ptr.vmem [resolvable:$true] %s87_s18 }
  0x17   :  { %p2536_p8 = scmp.ne.s32.totalorder %s3307_s10, %s2535_s25  ;;  %p2539_p9 = scmp.lt.u32.totalorder %s2535_s25, %s3307_s10 }
  0x19   :  { %p2541_p10 = pnand %p2539_p9, %p2536_p8 }
  0x1b   :  { %2544 = shalt.err (!%p2541_p10)
}
  0x1c   :  { %s2545_s6 = scalar_lea.vmem %s88_s18, 256  ;;  %p2550_p12 = scmp.lt.s32.totalorder %s88_s18, %s88_s18 }
  0x1d   :  { %p2546_p11 = scmp.ne.s32.totalorder %s88_s18, %s2545_s6  ;;  %p2551_p13 = scmp.lt.s32.totalorder %s2545_s6, %s2545_s6 }
  0x1f   :  { %p2552_p0 = por %p2551_p13, %p2550_p12 }
  0x21   :  { %p2553_p1 = pnand %p2552_p0, %p2546_p11 }
  0x23   :  { %2556 = shalt.err (!%p2553_p1)
}
  0x24   :  { %93 = dma.hbm_to_vmem [thread:$0]  %s3307_s10, 256, %s88_s18, [#allocation15], %s2690_s13, %s2690_s13, %s2691_s14  }
  0x25   :  { %s38_s16 = sshll.u32 %s3298_s1, 4  ;;  %s2557_s17 = scalar_lea.vmem %s29_s21, 16  ;;  %s39_s16 = int_to_ptr.vmem [resolvable:$true] %s38_s16 }
  0x26   :  { %p2558_p2 = scmp.ne.s32.totalorder %s29_s21, %s2557_s17  ;;  %p2562_p3 = scmp.lt.s32.totalorder %s29_s21, %s29_s21 }
  0x27   :  { %p2563_p4 = scmp.lt.s32.totalorder %s2557_s17, %s2557_s17 }
  0x29   :  { %p2564_p5 = por %p2563_p4, %p2562_p3 }
  0x2b   :  { %p2565_p6 = pnand %p2564_p5, %p2558_p2 }
  0x2d   :  { %2568 = shalt.err (!%p2565_p6)
}
  0x2e   :  { %s2693_s19 = smov [#allocation5]   ;;  %s2569_s20 = scalar_lea.vmem %s39_s16, 16 }
  0x2f   :  { %31 = dma.vmem_to_smem %s29_s21, 16, %s2693_s19, [#allocation7]  }
  0x30   :  { %p2570_p7 = scmp.ne.s32.totalorder %s39_s16, %s2569_s20  ;;  %p2574_p8 = scmp.lt.s32.totalorder %s39_s16, %s39_s16 }
  0x31   :  { %p2575_p9 = scmp.lt.s32.totalorder %s2569_s20, %s2569_s20 }
  0x33   :  { %p2576_p10 = por %p2575_p9, %p2574_p8 }
  0x35   :  { %p2577_p11 = pnand %p2576_p10, %p2570_p7 }
  0x37   :  { %2580 = shalt.err (!%p2577_p11)
}
  0x38   :  { %s2694_s10 = smov [#allocation8]   ;;  %s2695_s1 = smov [#allocation10]  }
  0x39   :  { %41 = dma.vmem_to_smem %s39_s16, 16, %s2694_s10, [#allocation9]  }
  0x3a   :  { %s47_s14 = sshll.u32 %s2695_s1, 4  ;;  %s2581_s24 = scalar_lea.hbm %s3301_s4, 512  ;;  %s48_s14 = int_to_ptr.vmem [resolvable:$true] %s47_s14 }
  0x3b   :  { %p2582_p12 = scmp.ne.s32.totalorder %s3301_s4, %s2581_s24  ;;  %p2585_p13 = scmp.lt.u32.totalorder %s2581_s24, %s3301_s4 }
  0x3d   :  { %p2587_p0 = pnand %p2585_p13, %p2582_p12 }
  0x3f   :  { %2590 = shalt.err (!%p2587_p0)
}
  0x40   :  { %s2591_s28 = scalar_lea.vmem %s48_s14, 512  ;;  %p2596_p2 = scmp.lt.s32.totalorder %s48_s14, %s48_s14 }
  0x41   :  { %p2592_p1 = scmp.ne.s32.totalorder %s48_s14, %s2591_s28  ;;  %p2597_p3 = scmp.lt.s32.totalorder %s2591_s28, %s2591_s28 }
  0x43   :  { %p2598_p4 = por %p2597_p3, %p2596_p2 }
  0x45   :  { %p2599_p5 = pnand %p2598_p4, %p2592_p1 }
  0x47   :  { %2602 = shalt.err (!%p2599_p5)
}
  0x48   :  { %s2696_s29 = smov 256   ;;  %s2697_s6 = smov 16  }
  0x49   :  { %53 = dma.hbm_to_vmem [thread:$0]  %s3301_s4, 512, %s48_s14, [#allocation6], %s2696_s29, %s2696_s29, %s2697_s6  }
  0x4a   :  { %s2698_s30 = smov [#allocation13]   ;;  %s2699_s16 = smov [#allocation16]  }
  0x4b   :  { %s74_s15 = sshll.u32 %s2698_s30, 4  ;;  %s100_s17 = sshll.u32 %s2699_s16, 4  ;;  %s75_s15 = int_to_ptr.vmem [resolvable:$true] %s74_s15  ;;  %s101_s17 = int_to_ptr.vmem [resolvable:$true] %s100_s17 }
  0x4c   :  { %s2603_s10 = scalar_lea.hbm %s3304_s7, 16 }
  0x4d   :  { %p2604_p6 = scmp.ne.s32.totalorder %s3304_s7, %s2603_s10  ;;  %p2607_p7 = scmp.lt.u32.totalorder %s2603_s10, %s3304_s7 }
  0x4f   :  { %p2609_p8 = pnand %p2607_p7, %p2604_p6 }
  0x51   :  { %2612 = shalt.err (!%p2609_p8)
}
  0x52   :  { %s2613_s4 = scalar_lea.vmem %s75_s15, 16  ;;  %s2617_s14 = scalar_lea.vmem %s75_s15, 32 }
  0x53   :  { %p2614_p9 = scmp.ne.s32.totalorder %s75_s15, %s2613_s4  ;;  %p2618_p10 = scmp.lt.s32.totalorder %s75_s15, %s75_s15 }
  0x54   :  { %p2619_p11 = scmp.lt.s32.totalorder %s2617_s14, %s2613_s4 }
  0x56   :  { %p2620_p12 = por %p2619_p11, %p2618_p10 }
  0x58   :  { %p2621_p13 = pnand %p2620_p12, %p2614_p9 }
  0x5a   :  { %2624 = shalt.err (!%p2621_p13)
}
  0x5b   :  { %77 = dma.hbm_to_vmem [thread:$0]  %s3304_s7, 16, %s75_s15, [#allocation12]  }
  0x5c   :  { %s2625_s28 = scalar_lea.hbm %s3308_s11, 16 }
  0x5d   :  { %p2626_p0 = scmp.ne.s32.totalorder %s3308_s11, %s2625_s28  ;;  %p2629_p1 = scmp.lt.u32.totalorder %s2625_s28, %s3308_s11 }
  0x5f   :  { %p2631_p2 = pnand %p2629_p1, %p2626_p0 }
  0x61   :  { %2634 = shalt.err (!%p2631_p2)
}
  0x62   :  { %s2635_s16 = scalar_lea.vmem %s101_s17, 16  ;;  %s2639_s19 = scalar_lea.vmem %s101_s17, 32 }
  0x63   :  { %p2636_p3 = scmp.ne.s32.totalorder %s101_s17, %s2635_s16  ;;  %p2640_p4 = scmp.lt.s32.totalorder %s101_s17, %s101_s17 }
  0x64   :  { %p2641_p5 = scmp.lt.s32.totalorder %s2639_s19, %s2635_s16 }
  0x66   :  { %p2642_p6 = por %p2641_p5, %p2640_p4 }
  0x68   :  { %p2643_p7 = pnand %p2642_p6, %p2636_p3 }
  0x6a   :  { %2646 = shalt.err (!%p2643_p7)
}
  0x6b   :  { %103 = dma.hbm_to_vmem [thread:$0]  %s3308_s11, 16, %s101_s17, [#allocation15]  }
  0x6c   :  { %2647 = dma.done.wait [#allocation7], 16  }
  0x6d   :  { %2648 = vsyncadd [#allocation7], 4294967280 }
  0x6e   :  { %2649 = dma.done.wait [#allocation9], 16  }
  0x6f   :  { %2650 = vsyncadd [#allocation9], 4294967280 }
  0x70   :  { %2651 = dma.done.wait [#allocation6], 512  }
  0x71   :  { %2652 = vsyncadd [#allocation6], 4294966784 }
  0x72   :  { %2653 = dma.done.wait [#allocation12], 144  }
  0x73   :  { %2654 = vsyncadd [#allocation12], 4294967152 }
  0x74   :  { %2655 = dma.done.wait [#allocation15], 272  }
  0x75   :  { %2656 = vsyncadd [#allocation15], 4294967024 }
  0x76   :  { %125 = sfence }
  0x77   :  { %s127_s20 = sld [smem:[#allocation5]] }
  0x7d   :  { %s128_s18 = scalar_lea.vmem %s3299_s2, %s127_s20 }
  0x7e   :  { %v146_v0 = vld [vmem:[%s128_s18] sm:$0x1] }
  0x7f   :  { %147 = vst [vmem:[#allocation2] sm:$0x1] %v146_v0 }
  0x80   :  { %172 = vsyncadd [#allocation4], 16  ;;  %s173_s11 = sld [smem:[#allocation8]] }
  0x86   :  { %s174_s24 = scalar_lea.vmem %s3300_s3, %s173_s11 }
  0x87   :  { %v193_v1 = vld [vmem:[%s174_s24] sm:$0x1] }
  0x88   :  { %194 = vst [vmem:[#allocation3] sm:$0x1] %v193_v1 }
  0x89   :  { %219 = vsyncadd [#allocation4 + $0x8], 16  ;;  %s2259_s4 = sld [smem:[#allocation5 + $0x1]] }
  0x8f   :  { %s221_s26 = scalar_lea.vmem %s3299_s2, %s2259_s4 }
  0x90   :  { %v241_v2 = vld [vmem:[%s221_s26] sm:$0x1] }
  0x91   :  { %242 = vst [vmem:[#allocation2 + $0x1] sm:$0x1] %v241_v2 }
  0x92   :  { %267 = vsyncadd [#allocation4 + $0x1], 16  ;;  %s2260_s21 = sld [smem:[#allocation8 + $0x1]] }
  0x98   :  { %s269_s29 = scalar_lea.vmem %s3300_s3, %s2260_s21 }
  0x99   :  { %v289_v3 = vld [vmem:[%s269_s29] sm:$0x1] }
  0x9a   :  { %290 = vst [vmem:[#allocation3 + $0x1] sm:$0x1] %v289_v3 }
  0x9b   :  { %315 = vsyncadd [#allocation4 + $0x9], 16  ;;  %s2261_s0 = sld [smem:[#allocation5 + $0x2]] }
  0xa1   :  { %s317_s16 = scalar_lea.vmem %s3299_s2, %s2261_s0 }
  0xa2   :  { %v337_v4 = vld [vmem:[%s317_s16] sm:$0x1] }
  0xa3   :  { %338 = vst [vmem:[#allocation2 + $0x2] sm:$0x1] %v337_v4 }
  0xa4   :  { %363 = vsyncadd [#allocation4 + $0x2], 16  ;;  %s2262_s19 = sld [smem:[#allocation8 + $0x2]] }
  0xaa   :  { %s365_s20 = scalar_lea.vmem %s3300_s3, %s2262_s19 }
  0xab   :  { %v385_v5 = vld [vmem:[%s365_s20] sm:$0x1] }
  0xac   :  { %386 = vst [vmem:[#allocation3 + $0x2] sm:$0x1] %v385_v5 }
  0xad   :  { %411 = vsyncadd [#allocation4 + $0xa], 16  ;;  %s2263_s10 = sld [smem:[#allocation5 + $0x3]] }
  0xb3   :  { %s413_s11 = scalar_lea.vmem %s3299_s2, %s2263_s10 }
  0xb4   :  { %v433_v6 = vld [vmem:[%s413_s11] sm:$0x1] }
  0xb5   :  { %434 = vst [vmem:[#allocation2 + $0x3] sm:$0x1] %v433_v6 }
  0xb6   :  { %459 = vsyncadd [#allocation4 + $0x3], 16  ;;  %s2264_s17 = sld [smem:[#allocation8 + $0x3]] }
  0xbc   :  { %s461_s4 = scalar_lea.vmem %s3300_s3, %s2264_s17 }
  0xbd   :  { %v481_v7 = vld [vmem:[%s461_s4] sm:$0x1] }
  0xbe   :  { %482 = vst [vmem:[#allocation3 + $0x3] sm:$0x1] %v481_v7 }
  0xbf   :  { %507 = vsyncadd [#allocation4 + $0xb], 16  ;;  %s2265_s14 = sld [smem:[#allocation5 + $0x4]] }
  0xc5   :  { %s509_s21 = scalar_lea.vmem %s3299_s2, %s2265_s14 }
  0xc6   :  { %v529_v8 = vld [vmem:[%s509_s21] sm:$0x1] }
  0xc7   :  { %530 = vst [vmem:[#allocation2 + $0x4] sm:$0x1] %v529_v8 }
  0xc8   :  { %555 = vsyncadd [#allocation4 + $0x4], 16  ;;  %s2266_s27 = sld [smem:[#allocation8 + $0x4]] }
  0xce   :  { %s557_s0 = scalar_lea.vmem %s3300_s3, %s2266_s27 }
  0xcf   :  { %v577_v9 = vld [vmem:[%s557_s0] sm:$0x1] }
  0xd0   :  { %578 = vst [vmem:[#allocation3 + $0x4] sm:$0x1] %v577_v9 }
  0xd1   :  { %603 = vsyncadd [#allocation4 + $0xc], 16  ;;  %s2267_s22 = sld [smem:[#allocation5 + $0x5]] }
  0xd7   :  { %s605_s19 = scalar_lea.vmem %s3299_s2, %s2267_s22 }
  0xd8   :  { %v625_v10 = vld [vmem:[%s605_s19] sm:$0x1] }
  0xd9   :  { %626 = vst [vmem:[#allocation2 + $0x5] sm:$0x1] %v625_v10 }
  0xda   :  { %651 = vsyncadd [#allocation4 + $0x5], 16  ;;  %s2268_s7 = sld [smem:[#allocation8 + $0x5]] }
  0xe0   :  { %s653_s10 = scalar_lea.vmem %s3300_s3, %s2268_s7 }
  0xe1   :  { %v673_v11 = vld [vmem:[%s653_s10] sm:$0x1] }
  0xe2   :  { %674 = vst [vmem:[#allocation3 + $0x5] sm:$0x1] %v673_v11 }
  0xe3   :  { %699 = vsyncadd [#allocation4 + $0xd], 16  ;;  %s2269_s1 = sld [smem:[#allocation5 + $0x6]] }
  0xe9   :  { %s701_s17 = scalar_lea.vmem %s3299_s2, %s2269_s1 }
  0xea   :  { %v721_v12 = vld [vmem:[%s701_s17] sm:$0x1] }
  0xeb   :  { %722 = vst [vmem:[#allocation2 + $0x6] sm:$0x1] %v721_v12 }
  0xec   :  { %747 = vsyncadd [#allocation4 + $0x6], 16  ;;  %s2270_s23 = sld [smem:[#allocation8 + $0x6]] }
  0xf2   :  { %s749_s14 = scalar_lea.vmem %s3300_s3, %s2270_s23 }
  0xf3   :  { %v769_v13 = vld [vmem:[%s749_s14] sm:$0x1] }
  0xf4   :  { %770 = vst [vmem:[#allocation3 + $0x6] sm:$0x1] %v769_v13 }
  0xf5   :  { %795 = vsyncadd [#allocation4 + $0xe], 16  ;;  %s2271_s25 = sld [smem:[#allocation5 + $0x7]] }
  0xfb   :  { %s797_s27 = scalar_lea.vmem %s3299_s2, %s2271_s25 }
  0xfc   :  { %v817_v14 = vld [vmem:[%s797_s27] sm:$0x1] }
  0xfd   :  { %818 = vst [vmem:[#allocation2 + $0x7] sm:$0x1] %v817_v14 }
  0xfe   :  { %843 = vsyncadd [#allocation4 + $0x7], 16  ;;  %s2272_s28 = sld [smem:[#allocation8 + $0x7]] }
 0x104   :  { %s845_s22 = scalar_lea.vmem %s3300_s3, %s2272_s28 }
 0x105   :  { %v865_v15 = vld [vmem:[%s845_s22] sm:$0x1] }
 0x106   :  { %866 = vst [vmem:[#allocation3 + $0x7] sm:$0x1] %v865_v15 }
 0x107   :  { %891 = vsyncadd [#allocation4 + $0xf], 16 }
 0x108   :  { %2657 = dma.done.wait [#allocation4], 16 }
 0x109   :  { %2658 = vsyncadd [#allocation4], 4294967280 }
 0x10a   :  { %2659 = dma.done.wait [#allocation4 + $0x8], 16 }
 0x10b   :  { %2660 = vsyncadd [#allocation4 + $0x8], 4294967280 }
 0x10c   :  { %2661 = dma.done.wait [#allocation4 + $0x1], 16 }
 0x10d   :  { %2662 = vsyncadd [#allocation4 + $0x1], 4294967280 }
 0x10e   :  { %2663 = dma.done.wait [#allocation4 + $0x9], 16 }
 0x10f   :  { %2664 = vsyncadd [#allocation4 + $0x9], 4294967280 }
 0x110   :  { %2665 = dma.done.wait [#allocation4 + $0x2], 16 }
 0x111   :  { %2666 = vsyncadd [#allocation4 + $0x2], 4294967280 }
 0x112   :  { %2667 = dma.done.wait [#allocation4 + $0xa], 16 }
 0x113   :  { %2668 = vsyncadd [#allocation4 + $0xa], 4294967280 }
 0x114   :  { %2669 = dma.done.wait [#allocation4 + $0x3], 16 }
 0x115   :  { %2670 = vsyncadd [#allocation4 + $0x3], 4294967280 }
 0x116   :  { %2671 = dma.done.wait [#allocation4 + $0xb], 16 }
 0x117   :  { %2672 = vsyncadd [#allocation4 + $0xb], 4294967280 }
 0x118   :  { %2673 = dma.done.wait [#allocation4 + $0x4], 16 }
 0x119   :  { %2674 = vsyncadd [#allocation4 + $0x4], 4294967280 }
 0x11a   :  { %2675 = dma.done.wait [#allocation4 + $0xc], 16 }
 0x11b   :  { %2676 = vsyncadd [#allocation4 + $0xc], 4294967280 }
 0x11c   :  { %2677 = dma.done.wait [#allocation4 + $0x5], 16 }
 0x11d   :  { %2678 = vsyncadd [#allocation4 + $0x5], 4294967280 }
 0x11e   :  { %2679 = dma.done.wait [#allocation4 + $0xd], 16 }
 0x11f   :  { %2680 = vsyncadd [#allocation4 + $0xd], 4294967280 }
 0x120   :  { %2681 = dma.done.wait [#allocation4 + $0x6], 16 }
 0x121   :  { %2682 = vsyncadd [#allocation4 + $0x6], 4294967280 }
 0x122   :  { %2683 = dma.done.wait [#allocation4 + $0xe], 16 }
 0x123   :  { %2684 = vsyncadd [#allocation4 + $0xe], 4294967280 }
 0x124   :  { %2685 = dma.done.wait [#allocation4 + $0x7], 16 }
 0x125   :  { %2686 = vsyncadd [#allocation4 + $0x7], 4294967280 }
 0x126   :  { %2687 = dma.done.wait [#allocation4 + $0xf], 16 }
 0x127   :  { %2688 = vsyncadd [#allocation4 + $0xf], 4294967280  ;;  %v926_v16 = vld [vmem:[#allocation3] sm:$0xff]  ;;  %s2700_s2 = smov 8   ;;  %v2458_v17 = vld [vmem:[#allocation11] sm:$0xff]   ;;  %v2701_v18 = vmov 0.0   ;;  %v955_v36 = vlaneseq }
 0x128   :  { %928 = vrot.lane.b32.xlu0 %v926_v16, %s2700_s2  ;;  %2397 = vmatprep.subr.bf16.mxu0 %v2701_v18  ;;  %vm2702_vm0 = vmmov 0   ;;  %vm931_vm1 = vcmask 64512   ;;  %v925_v19 = vld [vmem:[#allocation2] sm:$0xff]  ;;  %vm941_vm2 = vcmask 130048   ;;  %s2703_s3 = smov 32   ;;  %vm947_vm3 = vcmask 261120  }
 0x129   :  { %2398 = vmatpush3.bf16.msra.mxu0 %v2458_v17  ;;  %2399 = vmatprep.mubr.msk.bf16.mxu0 %vm2702_vm0, %v2701_v18  ;;  %v956_v37 = vshrl.u32 %v955_v36, 7  ;;  %v933_v39 = vld [vmem:[#allocation10] sm:$0xff]  ;;  %v934_v42 = vld [vmem:[#allocation10 + $0x8] sm:$0xff]  ;;  %vm953_vm4 = vcmask 523264  }
 0x12a   :  { %2403 = vmatprep.subr.bf16.mxu0 %v2701_v18 }
 0x12b   :  { %v2902_v38 = vsub.s32 0, %v956_v37  ;;  %v2904_v40 = vsub.s32 1, %v956_v37  ;;  %v2906_v41 = vsub.s32 2, %v956_v37  ;;  %v2908_v43 = vsub.s32 3, %v956_v37 }
 0x12c   :  { %v2910_v44 = vsub.s32 4, %v956_v37  ;;  %v2912_v45 = vsub.s32 5, %v956_v37  ;;  %v2914_v46 = vsub.s32 7, %v956_v37  ;;  %v2917_v48 = vsub.s32 6, %v956_v37 }
 0x12d   :  { %v958_v47 = vrot.slane %v933_v39, %v2902_v38  ;;  %v962_v49 = vrot.slane %v934_v42, %v2902_v38  ;;  %v968_v50 = vrot.slane %v933_v39, %v2904_v40  ;;  %v972_v51 = vrot.slane %v934_v42, %v2904_v40 }
 0x12e   :  { %v998_v52 = vrot.slane %v934_v42, %v2906_v41  ;;  %v988_v53 = vrot.slane %v934_v42, %v2908_v43  ;;  %v1008_v54 = vrot.slane %v934_v42, %v2910_v44  ;;  %v984_v55 = vrot.slane %v933_v39, %v2908_v43 }
 0x12f   :  { %v994_v56 = vrot.slane %v933_v39, %v2906_v41  ;;  %v1004_v58 = vrot.slane %v933_v39, %v2910_v44  ;;  %v1039_v59 = vrot.slane %v933_v39, %v2912_v45  ;;  %v1043_v60 = vrot.slane %v934_v42, %v2912_v45 }
 0x130   :  { %v1049_v61 = vrot.slane %v933_v39, %v2914_v46  ;;  %v1053_v63 = vrot.slane %v934_v42, %v2914_v46  ;;  %v1033_v0 = vrot.slane %v934_v42, %v2917_v48  ;;  %v1029_v1 = vrot.slane %v933_v39, %v2917_v48  ;;  %v2464_v39 = vld [vmem:[%s3302_s5 + $0x10] sm:$0xff]  }
 0x19a   :  { %v929_v20 = vpop.permute.xlu0 %928 }
 0x19b   :  { %v932_v21 = vsel %vm931_vm1, %v925_v19, %v929_v20 }
 0x19c   :  { %v2273_v22 = vmul.f32 -1.442695, %v932_v21  ;;  %938 = vrot.lane.b32.xlu0 %v932_v21, %s2697_s6  ;;  %s2704_s6 = smov 112  }
 0x19e   :  { %2501 = vpow2.f32 %v2273_v22  ;;  %v2962_v22 = vand.u32 127, %v955_v36 }
 0x1a0   :  { %vm1019_vm11 = vcmp.lt.s32.totalorder %v2962_v22, 112 }
 0x1a8   :  { %v2502_v23 = vpop.eup %2501 }
 0x1a9   :  { %v1113_v24 = vadd.f32 1.0, %v2502_v23 }
 0x1ab   :  { %2503 = vrcp.f32 %v1113_v24  ;;  %v2459_v24 = vld [vmem:[%s3302_s5 + $0x40] sm:$0xff]  }
 0x1ac   :  { %2341 = vmatprep.subr.bf16.mxu1 %v2459_v24 }
 0x1b5   :  { %v2504_v25 = vpop.eup %2503 }
 0x1b6   :  { %v1116_v26 = vmul.f32 %v2504_v25, %v932_v21  ;;  %v2460_v25 = vld [vmem:[%s3302_s5] sm:$0xff]  }
 0x1b7   :  { %2342 = vmatpush3.bf16.msra.mxu1 %v2460_v25 }
 0x1b8   :  { %v1151_v27 = vpack.c.bf16 %v1116_v26, %v1116_v26  ;;  %v2461_v26 = vld [vmem:[%s3302_s5 + $0x48] sm:$0xff]  }
 0x1b9   :  { %2343 = vmatprep.subr.bf16.mxu1 %v2461_v26 }
 0x1ba   :  { %2400 = vmatmul.mubr.msk.bf16.vlgmr.msra.gmra.mrb[0].mxu0 %vm941_vm2, %v1151_v27 }
 0x1bb   :  { %2407 = vmatprep.mubr.msk.bf16.mxu0 %vm2702_vm0, %v2701_v18 }
 0x20e   :  { %v939_v28 = vpop.permute.xlu0 %938 }
 0x20f   :  { %v942_v29 = vsel %vm941_vm2, %v932_v21, %v939_v28 }
 0x210   :  { %944 = vrot.lane.b32.xlu1 %v942_v29, %s2703_s3 }
 0x282   :  { %v945_v30 = vpop.permute.xlu1 %944 }
 0x283   :  { %v948_v31 = vsel %vm947_vm3, %v942_v29, %v945_v30 }
 0x284   :  { %950 = vrot.lane.b32.xlu1 %v948_v31, %s2690_s13 }
 0x28d   :  { %v2900_v32 = vpop.f32.mrb[0].mxu0 }
 0x28e   :  { %v2401_v33 = vpop.f32.mrb[1].mxu0 }
 0x28f   :  { %v1200_v34 = vpop.f32.mrb[2].mxu0 }
 0x290   :  { %v2402_v35 = vpop.f32.mrb[3].mxu0 }
 0x291   :  { %v2463_v35 = vld [vmem:[%s3302_s5 + $0x50] sm:$0xff]  }
 0x2f6   :  { %v951_v57 = vpop.permute.xlu1 %950 }
 0x2f7   :  { %v2932_v62 = vsel %vm953_vm4, %v948_v31, %v951_v57  ;;  %v2462_v31 = vld [vmem:[%s3302_s5 + $0x8] sm:$0xff]   ;;  %v2473_v57 = vld [vmem:[%s3302_s5 + $0x78] sm:$0xff]  }
 0x2f8   :  { %vm963_vm5 = vcmp.ge.f32.partialorder %v2932_v62, %v958_v47  ;;  %vm964_vm6 = vcmp.ge.f32.partialorder %v2932_v62, %v962_v49  ;;  %vm973_vm7 = vcmp.lt.f32.partialorder %v2932_v62, %v968_v50  ;;  %vm974_vm8 = vcmp.lt.f32.partialorder %v2932_v62, %v972_v51  ;;  %2344 = vmatpush3.bf16.msra.mxu1 %v2462_v31  ;;  %v2466_v50 = vld [vmem:[%s3302_s5 + $0x18] sm:$0xff]   ;;  %v2467_v51 = vld [vmem:[%s3302_s5 + $0x60] sm:$0xff]  }
 0x2f9   :  { %vm975_vm9 = vmand %vm963_vm5, %vm973_vm7  ;;  %v2942_v2 = vsub.f32 %v2932_v62, %v958_v47  ;;  %v2945_v3 = vsub.f32 %v2932_v62, %v962_v49  ;;  %v1000_v4 = vsub.f32 %v998_v52, %v2932_v62  ;;  %v999_v5 = vsub.f32 %v994_v56, %v2932_v62  ;;  %v2465_v49 = vld [vmem:[%s3302_s5 + $0x58] sm:$0xff]   ;;  %2345 = vmatprep.subr.bf16.mxu1 %v2463_v35  ;;  %v2468_v52 = vld [vmem:[%s3302_s5 + $0x20] sm:$0xff]  }
 0x2fa   :  { %vm976_vm10 = vmand %vm964_vm6, %vm974_vm8  ;;  %v977_v6 = vsel %vm975_vm9, 1.0, %v2701_v18  ;;  %v1044_v7 = vsub.f32 %v1039_v59, %v2932_v62  ;;  %v1045_v8 = vsub.f32 %v1043_v60, %v2932_v62  ;;  %v2472_v56 = vld [vmem:[%s3302_s5 + $0x30] sm:$0xff]   ;;  %v935_v59 = vld [vmem:[#allocation10 + $0x10] sm:$0x7]  ;;  %vm1456_vm5 = vcmp.lt.s32.totalorder %v2962_v22, 96 }
 0x2fb   :  { %v978_v9 = vsel %vm976_vm10, 1.0, %v2701_v18  ;;  %v990_v10 = vmul.f32 %v988_v53, %v2945_v3  ;;  %v1010_v11 = vmul.f32 %v1008_v54, %v1000_v4  ;;  %v989_v12 = vmul.f32 %v984_v55, %v2942_v2  ;;  %v2469_v53 = vld [vmem:[%s3302_s5 + $0x68] sm:$0xff]   ;;  %v2471_v55 = vld [vmem:[%s3302_s5 + $0x70] sm:$0xff]  }
 0x2fc   :  { %v2448_v13 = vpack.i.bf16 %v978_v9, %v977_v6  ;;  %v1009_v14 = vmul.f32 %v1004_v58, %v999_v5  ;;  %v2955_v15 = vmul.f32 %v1049_v61, %v1044_v7  ;;  %v2957_v16 = vmul.f32 %v1053_v63, %v1045_v8  ;;  %2346 = vmatpush3.bf16.msra.mxu1 %v2464_v39  ;;  %v2470_v54 = vld [vmem:[%s3302_s5 + $0x28] sm:$0xff]   ;;  %v2474_v58 = vld [vmem:[%s3302_s5 + $0x38] sm:$0xff]  }
 0x2fd   :  { %v1012_v17 = vmul.f32 %v990_v10, %v978_v9  ;;  %v1011_v19 = vmul.f32 %v989_v12, %v977_v6  ;;  %v1035_v20 = vmul.f32 %v1033_v0, %v2945_v3  ;;  %v1034_v21 = vmul.f32 %v1029_v1, %v2942_v2  ;;  %2347 = vmatprep.subr.bf16.mxu1 %v2465_v49  ;;  %v936_v60 = vld [vmem:[#allocation10 + $0x18] sm:$0x7]  ;;  %v2292_v39 = vld [vmem:[#allocation13] ss:$0 sm:$0xff] }
 0x2fe   :  { %2449 = vrot.lane.b32.xlu0 %v2448_v13, %s2704_s6  ;;  %v1071_v0 = vrot.slane %v935_v59, %v2904_v40  ;;  %v1075_v1 = vrot.slane %v936_v60, %v2904_v40 }
 0x300   :  { %2348 = vmatpush3.bf16.msra.mxu1 %v2466_v50  ;;  %v1076_v10 = vmul.f32 %v1071_v0, %v2942_v2  ;;  %v1095_v2 = vrot.slane %v936_v60, %v2906_v41 }
 0x301   :  { %2349 = vmatprep.subr.bf16.mxu1 %v2467_v51 }
 0x304   :  { %2350 = vmatpush3.bf16.msra.mxu1 %v2468_v52 }
 0x305   :  { %2351 = vmatprep.subr.bf16.mxu1 %v2469_v53 }
 0x308   :  { %2352 = vmatpush3.bf16.msra.mxu1 %v2470_v54 }
 0x309   :  { %2353 = vmatprep.subr.bf16.mxu1 %v2471_v55 }
 0x30c   :  { %2354 = vmatpush3.bf16.msra.mxu1 %v2472_v56 }
 0x30d   :  { %2355 = vmatprep.subr.bf16.mxu1 %v2473_v57 }
 0x310   :  { %2356 = vmatpush3.bf16.msra.mxu1 %v2474_v58  ;;  %v3058_v58 = vld [vmem:[%s3305_s8] sm:$0xff] }
 0x311   :  { %2411 = vmatprep.subr.bf16.mxu1 %v2701_v18  ;;  %v1366_v0 = vrot.slane %v3058_v58, %v2902_v38 }
 0x370   :  { %v2450_v23 = vpop.permute.xlu0 %2449 }
 0x371   :  { %v2452_v27 = vunpack.i.h.bf16 %v2450_v23  ;;  %v2451_v28 = vunpack.i.l.bf16 %v2450_v23 }
 0x373   :  { %v1020_v29 = vsel %vm1019_vm11, %v2451_v28, %v2452_v27  ;;  %v1021_v30 = vsel %vm1019_vm11, %v2452_v27, %v2451_v28 }
 0x374   :  { %v1023_v33 = vmul.f32 %v1021_v30, %v1010_v11  ;;  %v1022_v34 = vmul.f32 %v1020_v29, %v1009_v14  ;;  %v1077_v11 = vmul.f32 %v1075_v1, %v2945_v3  ;;  %v1081_v14 = vrot.slane %v935_v59, %v2902_v38 }
 0x376   :  { %v1025_v36 = vadd.f32 %v1023_v33, %v1012_v17  ;;  %v1024_v37 = vadd.f32 %v1022_v34, %v1011_v19  ;;  %v1091_v17 = vrot.slane %v935_v59, %v2906_v41  ;;  %v2476_v33 = vld [vmem:[#allocation14 + $0x8] sm:$0xff]  }
 0x377   :  { %v3063_v59 = vld [vmem:[%s3305_s8 + $0x8] sm:$0xff] }
 0x378   :  { %1060 = vrot.lane.b32.xlu0 %v1025_v36, %s2704_s6  ;;  %1058 = vrot.lane.b32.xlu1 %v1024_v37, %s2704_s6  ;;  %v1057_v42 = vmul.f32 %v1035_v20, %v1025_v36  ;;  %v1056_v47 = vmul.f32 %v1034_v21, %v1024_v37  ;;  %v1370_v1 = vrot.slane %v3063_v59, %v2902_v38 }
 0x3ea   :  { %v1061_v61 = vpop.permute.xlu0 %1060  ;;  %v1059_v63 = vpop.permute.xlu1 %1058 }
 0x3eb   :  { %v1062_v4 = vsel %vm1019_vm11, %v1059_v63, %v1061_v61  ;;  %v1063_v5 = vsel %vm1019_vm11, %v1061_v61, %v1059_v63 }
 0x3ec   :  { %v1064_v6 = vmul.f32 %v1062_v4, %v2955_v15  ;;  %v1065_v7 = vmul.f32 %v1063_v5, %v2957_v16  ;;  %v1085_v15 = vrot.slane %v936_v60, %v2902_v38  ;;  %v1086_v16 = vsub.f32 %v1081_v14, %v2932_v62 }
 0x3ed   :  { %v1381_v4 = vrot.slane %v3058_v58, %v2904_v40  ;;  %v1385_v5 = vrot.slane %v3063_v59, %v2904_v40 }
 0x3ee   :  { %v1067_v8 = vadd.f32 %v1065_v7, %v1057_v42  ;;  %v1066_v9 = vadd.f32 %v1064_v6, %v1056_v47  ;;  %v1087_v19 = vsub.f32 %v1085_v15, %v2932_v62  ;;  %v1096_v3 = vmul.f32 %v1091_v17, %v1086_v16  ;;  %v2475_v62 = vld [vmem:[#allocation14] sm:$0xff]  }
 0x3ef   :  { %2404 = vmatpush3.bf16.msra.mxu0 %v2475_v62  ;;  %v1424_v6 = vrot.slane %v3063_v59, %v2906_v41  ;;  %v1420_v7 = vrot.slane %v3058_v58, %v2906_v41  ;;  %v1499_v15 = vrot.slane %v3058_v58, %v2914_v46  ;;  %v1488_v17 = vrot.slane %v3063_v59, %v2912_v45 }
 0x3f0   :  { %1102 = vrot.lane.b32.xlu0 %v1067_v8, %s2704_s6  ;;  %1100 = vrot.lane.b32.xlu1 %v1066_v9, %s2704_s6  ;;  %v1098_v12 = vmul.f32 %v1076_v10, %v1066_v9  ;;  %v1099_v13 = vmul.f32 %v1077_v11, %v1067_v8  ;;  %v1097_v23 = vmul.f32 %v1095_v2, %v1087_v19 }
 0x3f1   :  { %2405 = vmatprep.subr.bf16.mxu0 %v2701_v18  ;;  %v1409_v8 = vrot.slane %v3063_v59, %v2908_v43  ;;  %v1439_v9 = vrot.slane %v3063_v59, %v2910_v44  ;;  %v1484_v11 = vrot.slane %v3058_v58, %v2912_v45  ;;  %v1503_v2 = vrot.slane %v3063_v59, %v2914_v46 }
 0x3f3   :  { %2406 = vmatpush3.bf16.msra.mxu0 %v2476_v33 }
 0x462   :  { %v1103_v20 = vpop.permute.xlu0 %1102  ;;  %v1101_v21 = vpop.permute.xlu1 %1100 }
 0x463   :  { %v1104_v24 = vsel %vm1019_vm11, %v1101_v21, %v1103_v20  ;;  %v1105_v25 = vsel %vm1019_vm11, %v1103_v20, %v1101_v21  ;;  %v1469_v21 = vrot.slane %v3058_v58, %v2917_v48 }
 0x464   :  { %v1106_v26 = vmul.f32 %v1104_v24, %v1096_v3  ;;  %v1107_v27 = vmul.f32 %v1105_v25, %v1097_v23  ;;  %v1473_v3 = vrot.slane %v3063_v59, %v2917_v48 }
 0x466   :  { %v1109_v28 = vadd.f32 %v1107_v27, %v1099_v13  ;;  %v1108_v29 = vadd.f32 %v1106_v26, %v1098_v12  ;;  %v1405_v12 = vrot.slane %v3058_v58, %v2908_v43  ;;  %v1435_v13 = vrot.slane %v3058_v58, %v2910_v44 }
 0x468   :  { %v1118_v30 = vpack.c.bf16 %v1109_v28, %v1109_v28  ;;  %v1117_v31 = vpack.c.bf16 %v1108_v29, %v1108_v29 }
 0x46a   :  { %1331 = vmatprep.mubr.bf16.mxu1 %v1118_v30 }
 0x46b   :  { %1332 = vmatmul.mubr.bf16.vlgmr.msra.gmra.mrb[0].mxu1 %v1117_v31 }
 0x46c   :  { %2427 = vmatprep.mubr.msk.bf16.mxu1 %vm2702_vm0, %v2701_v18 }
 0x53e   :  { %v2357_v34 = vpop.f32.mrb[0].mxu1 }
 0x53f   :  { %v2358_v35 = vpop.f32.mrb[1].mxu1 }
 0x540   :  { %v2359_v36 = vadd.f32 %v2358_v35, %v2357_v34  ;;  %v2360_v37 = vpop.f32.mrb[2].mxu1 }
 0x541   :  { %v2361_v42 = vpop.f32.mrb[3].mxu1 }
 0x542   :  { %v1334_v47 = vadd.f32 %v2359_v36, %v2900_v32  ;;  %v3053_v32 = vld [vmem:[%s3305_s8 + $0x10] sm:$0xff] }
 0x543   :  { %v1374_v60 = vrot.slane %v3053_v32, %v2902_v38  ;;  %v1389_v61 = vrot.slane %v3053_v32, %v2904_v40  ;;  %v1413_v63 = vrot.slane %v3053_v32, %v2908_v43  ;;  %v1428_v10 = vrot.slane %v3053_v32, %v2906_v41 }
 0x544   :  { %v1346_v49 = vadd.f32 %v2292_v39, %v1334_v47  ;;  %v1443_v14 = vrot.slane %v3053_v32, %v2910_v44  ;;  %v1492_v19 = vrot.slane %v3053_v32, %v2912_v45  ;;  %v1507_v43 = vrot.slane %v3053_v32, %v2914_v46 }
 0x545   :  { %v1477_v44 = vrot.slane %v3053_v32, %v2917_v48 }
 0x546   :  { %v2293_v50 = vmul.f32 -1.442695, %v1346_v49  ;;  %1354 = vrot.lane.b32.xlu1 %v1346_v49, %s2703_s3 }
 0x548   :  { %2505 = vpow2.f32 %v2293_v50 }
 0x552   :  { %v2506_v51 = vpop.eup %2505 }
 0x553   :  { %v1595_v52 = vadd.f32 1.0, %v2506_v51 }
 0x555   :  { %2507 = vrcp.f32 %v1595_v52 }
 0x55f   :  { %v2508_v53 = vpop.eup %2507 }
 0x560   :  { %v1598_v54 = vmul.f32 %v2508_v53, %v1346_v49 }
 0x562   :  { %v1650_v55 = vpack.c.bf16 %v1598_v54, %v1598_v54 }
 0x564   :  { %2408 = vmatmul.mubr.msk.bf16.vlgmr.msra.gmra.mrb[4].mxu0 %vm947_vm3, %v1650_v55 }
 0x5b8   :  { %v1355_v56 = vpop.permute.xlu1 %1354 }
 0x5b9   :  { %v1357_v57 = vsel %vm947_vm3, %v1346_v49, %v1355_v56 }
 0x5ba   :  { %1359 = vrot.lane.b32.xlu0 %v1357_v57, %s2690_s13  ;;  %s2705_s13 = smov 96  }
 0x62c   :  { %v1360_v16 = vpop.permute.xlu0 %1359 }
 0x62d   :  { %v3108_v20 = vsel %vm953_vm4, %v1357_v57, %v1360_v16  ;;  %v2479_v16 = vld [vmem:[%s3306_s9 + $0x80] sm:$0xff]  }
 0x62e   :  { %vm1377_vm12 = vcmp.ge.f32.partialorder %v3108_v20, %v1374_v60  ;;  %vm1392_vm13 = vcmp.lt.f32.partialorder %v3108_v20, %v1389_v61  ;;  %v3119_v45 = vsub.f32 %v3108_v20, %v1374_v60  ;;  %vm1375_vm14 = vcmp.ge.f32.partialorder %v3108_v20, %v1366_v0  ;;  %2412 = vmatpush3.bf16.msra.mxu1 %v2479_v16 }
 0x62f   :  { %vm1395_vm15 = vmand %vm1377_vm12, %vm1392_vm13  ;;  %vm1376_vm0 = vcmp.ge.f32.partialorder %v3108_v20, %v1370_v1  ;;  %vm1390_vm1 = vcmp.lt.f32.partialorder %v3108_v20, %v1381_v4  ;;  %vm1391_vm2 = vcmp.lt.f32.partialorder %v3108_v20, %v1385_v5  ;;  %v3126_v46 = vsub.f32 %v3108_v20, %v1366_v0  ;;  %2413 = vmatprep.subr.bf16.mxu1 %v2701_v18 }
 0x630   :  { %v1398_v48 = vsel %vm1395_vm15, 1.0, %v2701_v18  ;;  %v1416_v23 = vmul.f32 %v1413_v63, %v3119_v45  ;;  %vm1393_vm3 = vmand %vm1375_vm14, %vm1390_vm1  ;;  %v3131_v24 = vsub.f32 %v3108_v20, %v1370_v1  ;;  %v1430_v25 = vsub.f32 %v1424_v6, %v3108_v20 }
 0x631   :  { %1454 = vrot.lane.b32.xlu0 %v1398_v48, %s2705_s13  ;;  %vm1394_vm4 = vmand %vm1376_vm0, %vm1391_vm2  ;;  %v1396_v26 = vsel %vm1393_vm3, 1.0, %v2701_v18  ;;  %v1414_v27 = vmul.f32 %v1405_v12, %v3126_v46  ;;  %v1429_v28 = vsub.f32 %v1420_v7, %v3108_v20  ;;  %v1431_v29 = vsub.f32 %v1428_v10, %v3108_v20 }
 0x632   :  { %v1449_v30 = vmul.f32 %v1416_v23, %v1398_v48  ;;  %v1397_v31 = vsel %vm1394_vm4, 1.0, %v2701_v18  ;;  %v1415_v62 = vmul.f32 %v1409_v8, %v3131_v24  ;;  %v1445_v33 = vmul.f32 %v1439_v9, %v1430_v25  ;;  %v2487_v48 = vld [vmem:[%s3306_s9 + $0x18] sm:$0xff]   ;;  %v2489_v25 = vld [vmem:[%s3306_s9 + $0x60] sm:$0xff]  }
 0x633   :  { %v2453_v34 = vpack.i.bf16 %v1397_v31, %v1396_v26  ;;  %v1444_v35 = vmul.f32 %v1435_v13, %v1429_v28  ;;  %v1447_v36 = vmul.f32 %v1414_v27, %v1396_v26  ;;  %v1446_v37 = vmul.f32 %v1443_v14, %v1431_v29  ;;  %v2477_v14 = vld [vmem:[%s3306_s9 + $0x40] sm:$0xff]   ;;  %v2488_v23 = vld [vmem:[%s3306_s9 + $0x98] sm:$0xff]   ;;  %v2492_v28 = vld [vmem:[%s3306_s9 + $0x68] sm:$0xff]  }
 0x634   :  { %v1448_v39 = vmul.f32 %v1415_v62, %v1397_v31  ;;  %v1493_v42 = vsub.f32 %v1484_v11, %v3108_v20  ;;  %v1494_v47 = vsub.f32 %v1488_v17, %v3108_v20  ;;  %v1495_v49 = vsub.f32 %v1492_v19, %v3108_v20  ;;  %v2480_v17 = vld [vmem:[%s3306_s9 + $0x48] sm:$0xff]   ;;  %2366 = vmatprep.subr.bf16.mxu0 %v2477_v14  ;;  %v2490_v26 = vld [vmem:[%s3306_s9 + $0x20] sm:$0xff]   ;;  %v1350_v31 = vld [vmem:[%s3305_s8 + $0x18] sm:$0x7] }
 0x635   :  { %2454 = vrot.lane.b32.xlu1 %v2453_v34, %s2705_s13  ;;  %v1480_v50 = vmul.f32 %v1477_v44, %v3119_v45  ;;  %v1479_v51 = vmul.f32 %v1473_v3, %v3131_v24  ;;  %v1478_v55 = vmul.f32 %v1469_v21, %v3126_v46  ;;  %v2481_v19 = vld [vmem:[%s3306_s9 + $0x8] sm:$0xff]   ;;  %v2484_v44 = vld [vmem:[%s3306_s9 + $0x10] sm:$0xff]   ;;  %v2486_v21 = vld [vmem:[%s3306_s9 + $0x58] sm:$0xff]   ;;  %v1532_v34 = vrot.slane %v1350_v31, %v2904_v40 }
 0x636   :  { %v3147_v52 = vmul.f32 %v1499_v15, %v1493_v42  ;;  %v3149_v53 = vmul.f32 %v1503_v2, %v1494_v47  ;;  %v3151_v54 = vmul.f32 %v1507_v43, %v1495_v49  ;;  %v2478_v15 = vld [vmem:[%s3306_s9] sm:$0xff]   ;;  %v2482_v2 = vld [vmem:[%s3306_s9 + $0x88] sm:$0xff]   ;;  %v2483_v43 = vld [vmem:[%s3306_s9 + $0x50] sm:$0xff]  }
 0x637   :  { %v3154_v56 = vpop.f32.mrb[4].mxu0  ;;  %2367 = vmatpush3.bf16.msra.mxu0 %v2478_v15  ;;  %2414 = vmatpush3.bf16.msra.mxu1 %v2482_v2  ;;  %v2485_v3 = vld [vmem:[%s3306_s9 + $0x90] sm:$0xff]   ;;  %v2491_v27 = vld [vmem:[%s3306_s9 + $0xa0] sm:$0xff]   ;;  %v2493_v29 = vld [vmem:[%s3306_s9 + $0x28] sm:$0xff]  }
 0x638   :  { %v2409_v57 = vpop.f32.mrb[5].mxu0  ;;  %2368 = vmatprep.subr.bf16.mxu0 %v2480_v17  ;;  %2415 = vmatprep.subr.bf16.mxu1 %v2701_v18  ;;  %v1351_v42 = vld [vmem:[%s3305_s8 + $0x20] sm:$0x7] }
 0x639   :  { %v1707_v32 = vpop.f32.mrb[6].mxu0  ;;  %v1536_v49 = vrot.slane %v1351_v42, %v2904_v40  ;;  %v2495_v57 = vld [vmem:[%s3306_s9 + $0x70] sm:$0xff]  }
 0x63a   :  { %v2410_v58 = vpop.f32.mrb[7].mxu0 }
 0x63b   :  { %2369 = vmatpush3.bf16.msra.mxu0 %v2481_v19  ;;  %2416 = vmatpush3.bf16.msra.mxu1 %v2485_v3 }
 0x63c   :  { %2370 = vmatprep.subr.bf16.mxu0 %v2483_v43  ;;  %2417 = vmatprep.subr.bf16.mxu1 %v2701_v18 }
 0x63f   :  { %2371 = vmatpush3.bf16.msra.mxu0 %v2484_v44  ;;  %2418 = vmatpush3.bf16.msra.mxu1 %v2488_v23 }
 0x640   :  { %2372 = vmatprep.subr.bf16.mxu0 %v2486_v21  ;;  %2419 = vmatprep.subr.bf16.mxu1 %v2701_v18 }
 0x643   :  { %2373 = vmatpush3.bf16.msra.mxu0 %v2487_v48  ;;  %2420 = vmatpush3.bf16.msra.mxu1 %v2491_v27 }
 0x644   :  { %2374 = vmatprep.subr.bf16.mxu0 %v2489_v25  ;;  %2421 = vmatprep.subr.bf16.mxu1 %v2701_v18 }
 0x647   :  { %2375 = vmatpush3.bf16.msra.mxu0 %v2490_v26 }
 0x648   :  { %2376 = vmatprep.subr.bf16.mxu0 %v2492_v28 }
 0x64b   :  { %2377 = vmatpush3.bf16.msra.mxu0 %v2493_v29 }
 0x64c   :  { %2378 = vmatprep.subr.bf16.mxu0 %v2495_v57 }
 0x6a3   :  { %v1455_v63 = vpop.permute.xlu0 %1454 }
 0x6a7   :  { %v2455_v59 = vpop.permute.xlu1 %2454 }
 0x6a8   :  { %v2457_v60 = vunpack.i.h.bf16 %v2455_v59  ;;  %v2456_v61 = vunpack.i.l.bf16 %v2455_v59 }
 0x6aa   :  { %v1457_v0 = vsel %vm1456_vm5, %v2457_v60, %v1455_v63  ;;  %v1458_v1 = vsel %vm1456_vm5, %v2456_v61, %v2457_v60  ;;  %v1459_v4 = vsel %vm1456_vm5, %v1455_v63, %v2456_v61  ;;  %v2498_v60 = vld [vmem:[%s3306_s9 + $0x78] sm:$0xff]   ;;  %v1542_v63 = vmul.f32 %v1536_v49, %v3131_v24 }
 0x6ab   :  { %v1461_v5 = vmul.f32 %v1457_v0, %v1445_v33  ;;  %v1460_v6 = vmul.f32 %v1458_v1, %v1444_v35  ;;  %v1462_v7 = vmul.f32 %v1459_v4, %v1446_v37  ;;  %v1352_v37 = vld [vmem:[%s3305_s8 + $0x28] sm:$0x7]  ;;  %v2499_v0 = vld [vmem:[%s3306_s9 + $0x38] sm:$0xff]   ;;  %v1551_v24 = vrot.slane %v1351_v42, %v2902_v38 }
 0x6ac   :  { %v2500_v1 = vld [vmem:[%s3306_s9 + $0xb8] sm:$0xff]   ;;  %v1570_v14 = vrot.slane %v1352_v37, %v2906_v41 }
 0x6ad   :  { %v1464_v8 = vadd.f32 %v1461_v5, %v1448_v39  ;;  %v1463_v9 = vadd.f32 %v1460_v6, %v1447_v36  ;;  %v1465_v10 = vadd.f32 %v1462_v7, %v1449_v30  ;;  %v2494_v30 = vld [vmem:[%s3306_s9 + $0xa8] sm:$0xff]   ;;  %v1540_v39 = vrot.slane %v1352_v37, %v2904_v40  ;;  %v2496_v40 = vld [vmem:[%s3306_s9 + $0x30] sm:$0xff]  }
 0x6ae   :  { %2422 = vmatpush3.bf16.msra.mxu1 %v2494_v30  ;;  %2379 = vmatpush3.bf16.msra.mxu0 %v2496_v40  ;;  %v1557_v5 = vsub.f32 %v1551_v24, %v3108_v20  ;;  %v1566_v6 = vrot.slane %v1351_v42, %v2906_v41  ;;  %v1547_v7 = vrot.slane %v1350_v31, %v2902_v38 }
 0x6af   :  { %1516 = vrot.lane.b32.xlu0 %v1464_v8, %s2705_s13  ;;  %1514 = vrot.lane.b32.xlu1 %v1463_v9, %s2705_s13  ;;  %v3165_v11 = vmul.f32 %v1480_v50, %v1465_v10  ;;  %v3167_v12 = vmul.f32 %v1479_v51, %v1464_v8  ;;  %v1511_v13 = vmul.f32 %v1478_v55, %v1463_v9 }
 0x6b0   :  { %2423 = vmatprep.subr.bf16.mxu1 %v2701_v18  ;;  %v1541_v51 = vmul.f32 %v1532_v34, %v3126_v46  ;;  %v2497_v46 = vld [vmem:[%s3306_s9 + $0xb0] sm:$0xff]   ;;  %v1543_v61 = vmul.f32 %v1540_v39, %v3119_v45  ;;  %2380 = vmatprep.subr.bf16.mxu0 %v2498_v60  ;;  %v1562_v8 = vrot.slane %v1350_v31, %v2906_v41 }
 0x6b2   :  { %2424 = vmatpush3.bf16.msra.mxu1 %v2497_v46  ;;  %2381 = vmatpush3.bf16.msra.mxu0 %v2499_v0 }
 0x6b3   :  { %1518 = vrot.lane.b32.xlu1 %v1465_v10, %s2705_s13  ;;  %2425 = vmatprep.subr.bf16.mxu1 %v2701_v18  ;;  %v1555_v18 = vrot.slane %v1352_v37, %v2902_v38  ;;  %v1572_v10 = vmul.f32 %v1566_v6, %v1557_v5 }
 0x6b6   :  { %2426 = vmatpush3.bf16.msra.mxu1 %v2500_v1 }
 0x721   :  { %v1517_v62 = vpop.permute.xlu0 %1516  ;;  %v1515_v33 = vpop.permute.xlu1 %1514 }
 0x722   :  { %v1521_v35 = vsel %vm1456_vm5, %v1515_v33, %v1517_v62 }
 0x723   :  { %v1523_v36 = vmul.f32 %v1521_v35, %v3147_v52  ;;  %v2321_v35 = vld [vmem:[#allocation16] ss:$0 sm:$0xff] }
 0x725   :  { %v1519_v47 = vpop.permute.xlu1 %1518  ;;  %v1526_v50 = vadd.f32 %v1523_v36, %v1511_v13  ;;  %v1558_v13 = vsub.f32 %v1555_v18, %v3108_v20 }
 0x726   :  { %v1520_v55 = vsel %vm1456_vm5, %v1517_v62, %v1519_v47  ;;  %v1522_v52 = vsel %vm1456_vm5, %v1519_v47, %v1515_v33 }
 0x727   :  { %v1524_v32 = vmul.f32 %v1520_v55, %v3149_v53  ;;  %v1525_v58 = vmul.f32 %v1522_v52, %v3151_v54  ;;  %v1574_v59 = vmul.f32 %v1541_v51, %v1526_v50  ;;  %v1573_v19 = vmul.f32 %v1570_v14, %v1558_v13 }
 0x729   :  { %v1528_v53 = vadd.f32 %v1525_v58, %v3165_v11  ;;  %v1527_v54 = vadd.f32 %v1524_v32, %v3167_v12  ;;  %v1556_v12 = vsub.f32 %v1547_v7, %v3108_v20 }
 0x72b   :  { %1581 = vrot.lane.b32.xlu1 %v1528_v53, %s2705_s13  ;;  %v1576_v45 = vmul.f32 %v1543_v61, %v1528_v53  ;;  %1579 = vrot.lane.b32.xlu0 %v1527_v54, %s2705_s13  ;;  %v1575_v4 = vmul.f32 %v1542_v63, %v1527_v54  ;;  %v1571_v17 = vmul.f32 %v1562_v8, %v1556_v12 }
 0x72f   :  { %1577 = vrot.lane.b32.xlu0 %v1526_v50, %s2705_s13 }
 0x79d   :  { %v1582_v9 = vpop.permute.xlu1 %1581  ;;  %v1580_v11 = vpop.permute.xlu0 %1579 }
 0x79e   :  { %v1583_v15 = vsel %vm1456_vm5, %v1580_v11, %v1582_v9 }
 0x79f   :  { %v1587_v16 = vmul.f32 %v1583_v15, %v1572_v10 }
 0x7a1   :  { %v1578_v2 = vpop.permute.xlu0 %1577  ;;  %v1590_v43 = vadd.f32 %v1587_v16, %v1575_v4 }
 0x7a2   :  { %v1584_v38 = vsel %vm1456_vm5, %v1578_v2, %v1580_v11  ;;  %v1585_v44 = vsel %vm1456_vm5, %v1582_v9, %v1578_v2 }
 0x7a3   :  { %v1586_v3 = vmul.f32 %v1584_v38, %v1571_v17  ;;  %v1588_v21 = vmul.f32 %v1585_v44, %v1573_v19  ;;  %v1600_v48 = vpack.c.bf16 %v1590_v43, %v1590_v43 }
 0x7a5   :  { %v1589_v20 = vadd.f32 %v1586_v3, %v1574_v59  ;;  %v1591_v23 = vadd.f32 %v1588_v21, %v1576_v45  ;;  %1886 = vmatprep.mubr.bf16.mxu0 %v1600_v48 }
 0x7a7   :  { %v1599_v41 = vpack.c.bf16 %v1589_v20, %v1589_v20  ;;  %v1601_v25 = vpack.c.bf16 %v1591_v23, %v1591_v23 }
 0x7a9   :  { %1887 = vmatmul.mubr.bf16.vlgmr.msra.gmra.mrb[8].mxu0 %v1599_v41  ;;  %2428 = vmatmul.mubr.bf16.vlgmr.msra.gmra.mrb[4].mxu1 %v1601_v25 }
 0x87c   :  { %v2382_v26 = vpop.f32.mrb[8].mxu0  ;;  %v1928_v27 = vpop.f32.mrb[4].mxu1 }
 0x87d   :  { %v2383_v28 = vpop.f32.mrb[9].mxu0  ;;  %v2429_v29 = vpop.f32.mrb[5].mxu1 }
 0x87e   :  { %v2384_v30 = vadd.f32 %v2383_v28, %v2382_v26  ;;  %v2385_v31 = vpop.f32.mrb[10].mxu0  ;;  %v1931_v62 = vpop.f32.mrb[6].mxu1 }
 0x87f   :  { %v2386_v33 = vpop.f32.mrb[11].mxu0  ;;  %v2430_v22 = vpop.f32.mrb[7].mxu1 }
 0x880   :  { %v1889_v34 = vadd.f32 %v2384_v30, %v3154_v56 }
 0x882   :  { %v1929_v36 = vadd.f32 %v1928_v27, %v1889_v34 }
 0x884   :  { %v1941_v37 = vadd.f32 %v2321_v35, %v1929_v36 }
 0x886   :  { %v2322_v39 = vmul.f32 -1.442695, %v1941_v37 }
 0x888   :  { %2509 = vpow2.f32 %v2322_v39 }
 0x892   :  { %v2510_v42 = vpop.eup %2509 }
 0x893   :  { %v1945_v47 = vadd.f32 1.0, %v2510_v42 }
 0x895   :  { %2511 = vrcp.f32 %v1945_v47 }
 0x89f   :  { %v2512_v49 = vpop.eup %2511 }
 0x8a0   :  { %1948 = vst [vmem:[%s3309_s12] sm:$0xff] %v2512_v49 }
 0x8a1   :  { %1953 = vsyncpa [#allocation6], 1 }
 0x8a2   :  { %1954 = vsyncpa [#allocation12], 1 }
 0x8a3   :  { %1955 = vsyncpa [#allocation15], 1 }
 0x8a4   :  { %1956 = vsyncpa [#allocation7], 1 }
 0x8a5   :  { %1957 = vsyncpa [#allocation9], 1 }
 0x8a6   :  { %1958 = vsyncmov [#allocation4] }
 0x8a9   :  { %s1959_s17 = vpop.sfrf %1958 }
 0x8aa   :  { %p2323_p8 = scmp.ne.s32.totalorder %s1959_s17, 0 }
 0x8ac   :  { %1963 = shalt.err (%p2323_p8)  }
 0x8ad   :  { %1965 = vsyncmov [#allocation4 + $0x1] }
 0x8b0   :  { %s1966_s23 = vpop.sfrf %1965 }
 0x8b1   :  { %p2324_p9 = scmp.ne.s32.totalorder %s1966_s23, 0 }
 0x8b3   :  { %1970 = shalt.err (%p2324_p9)  }
 0x8b4   :  { %1972 = vsyncmov [#allocation4 + $0x2] }
 0x8b7   :  { %s1973_s24 = vpop.sfrf %1972 }
 0x8b8   :  { %p2325_p10 = scmp.ne.s32.totalorder %s1973_s24, 0 }
 0x8ba   :  { %1977 = shalt.err (%p2325_p10)  }
 0x8bb   :  { %1979 = vsyncmov [#allocation4 + $0x3] }
 0x8be   :  { %s1980_s4 = vpop.sfrf %1979 }
 0x8bf   :  { %p2326_p11 = scmp.ne.s32.totalorder %s1980_s4, 0 }
 0x8c1   :  { %1984 = shalt.err (%p2326_p11)  }
 0x8c2   :  { %1986 = vsyncmov [#allocation4 + $0x4] }
 0x8c5   :  { %s1987_s12 = vpop.sfrf %1986 }
 0x8c6   :  { %p2327_p12 = scmp.ne.s32.totalorder %s1987_s12, 0 }
 0x8c8   :  { %1991 = shalt.err (%p2327_p12)  }
 0x8c9   :  { %1993 = vsyncmov [#allocation4 + $0x5] }
 0x8cc   :  { %s1994_s14 = vpop.sfrf %1993 }
 0x8cd   :  { %p2328_p13 = scmp.ne.s32.totalorder %s1994_s14, 0 }
 0x8cf   :  { %1998 = shalt.err (%p2328_p13)  }
 0x8d0   :  { %2000 = vsyncmov [#allocation4 + $0x6] }
 0x8d3   :  { %s2001_s25 = vpop.sfrf %2000 }
 0x8d4   :  { %p2329_p0 = scmp.ne.s32.totalorder %s2001_s25, 0 }
 0x8d6   :  { %2005 = shalt.err (%p2329_p0)  }
 0x8d7   :  { %2007 = vsyncmov [#allocation4 + $0x7] }
 0x8da   :  { %s2008_s26 = vpop.sfrf %2007 }
 0x8db   :  { %p2330_p1 = scmp.ne.s32.totalorder %s2008_s26, 0 }
 0x8dd   :  { %2012 = shalt.err (%p2330_p1)  }
 0x8de   :  { %2014 = vsyncmov [#allocation4 + $0x8] }
 0x8e1   :  { %s2015_s21 = vpop.sfrf %2014 }
 0x8e2   :  { %p2331_p2 = scmp.ne.s32.totalorder %s2015_s21, 0 }
 0x8e4   :  { %2019 = shalt.err (%p2331_p2)  }
 0x8e5   :  { %2021 = vsyncmov [#allocation4 + $0x9] }
 0x8e8   :  { %s2022_s27 = vpop.sfrf %2021 }
 0x8e9   :  { %p2332_p3 = scmp.ne.s32.totalorder %s2022_s27, 0 }
 0x8eb   :  { %2026 = shalt.err (%p2332_p3)  }
 0x8ec   :  { %2028 = vsyncmov [#allocation4 + $0xa] }
 0x8ef   :  { %s2029_s28 = vpop.sfrf %2028 }
 0x8f0   :  { %p2333_p4 = scmp.ne.s32.totalorder %s2029_s28, 0 }
 0x8f2   :  { %2033 = shalt.err (%p2333_p4)  }
 0x8f3   :  { %2035 = vsyncmov [#allocation4 + $0xb] }
 0x8f6   :  { %s2036_s29 = vpop.sfrf %2035 }
 0x8f7   :  { %p2334_p5 = scmp.ne.s32.totalorder %s2036_s29, 0 }
 0x8f9   :  { %2040 = shalt.err (%p2334_p5)  }
 0x8fa   :  { %2042 = vsyncmov [#allocation4 + $0xc] }
 0x8fd   :  { %s2043_s0 = vpop.sfrf %2042 }
 0x8fe   :  { %p2335_p6 = scmp.ne.s32.totalorder %s2043_s0, 0 }
 0x900   :  { %2047 = shalt.err (%p2335_p6)  }
 0x901   :  { %2049 = vsyncmov [#allocation4 + $0xd] }
 0x904   :  { %s2050_s22 = vpop.sfrf %2049 }
 0x905   :  { %p2336_p7 = scmp.ne.s32.totalorder %s2050_s22, 0 }
 0x907   :  { %2054 = shalt.err (%p2336_p7)  }
 0x908   :  { %2056 = vsyncmov [#allocation4 + $0xe] }
 0x90b   :  { %s2057_s2 = vpop.sfrf %2056 }
 0x90c   :  { %p2337_p8 = scmp.ne.s32.totalorder %s2057_s2, 0 }
 0x90e   :  { %2061 = shalt.err (%p2337_p8)  }
 0x90f   :  { %2063 = vsyncmov [#allocation4 + $0xf] }
 0x912   :  { %s2064_s30 = vpop.sfrf %2063 }
 0x913   :  { %p2338_p9 = scmp.ne.s32.totalorder %s2064_s30, 0 }
 0x915   :  { %2068 = shalt.err (%p2338_p9)  }

</bundles_post_ra>
